<compile_context>
chip_gen: v7x
topology: tpu7x:2x2x1
jax: 0.10.0
libtpu: 0.0.40
codegen_flags: <defaults>
</compile_context>

<pallas_src>
import functools
import math

import jax
import jax.numpy as jnp
from jax.experimental import pallas as pl
from jax.experimental.pallas import tpu as pltpu

NUM_CLASSES = 10
NUM_CLASSES_PAD = 128            # 10 -> 128  (lane-dense fc6 output)
HIDDEN = 300
HIDDEN_PAD = 384                 # 300 -> 384 (3 * 128, lane-dense hidden)
BN_EPS = 1e-5
SUBLANE = 8
LANE = 128

MAX_TB = 256                             # rows per batch tile (MXU pass)
VMEM_LIMIT_BYTES = 32 * 1024 * 1024      # explicit scoped-VMEM budget (>= v5e 16MiB default)
KTILE_VMEM_BUDGET = 16 * 1024 * 1024     # budget for double-buffered flat+w5 K tiles


def _round_up(n, m):
    return (n + m - 1) // m * m


def _choose_tk(k_pad, tb, w_bytes):
    """Largest lane-aligned K tile dividing k_pad whose double-buffered
    (flat tile + w5 tile) footprint fits the VMEM budget."""
    best = LANE
    t = LANE
    while t <= k_pad:
        if k_pad % t == 0:
            footprint = 2 * (t * HIDDEN_PAD * w_bytes + tb * t * 4)
            if footprint <= KTILE_VMEM_BUDGET:
                best = t
        t += LANE
    return best


# ---------------------------------------------------------------------------
# Kernel
# ---------------------------------------------------------------------------
def _make_kernel(emit_fc5):
    """fc5 (K-tiled accumulate) -> relu -> folded BN affine -> fc6."""

    def kernel(flat_ref, w5_ref, vecs_ref, w6_ref, b6_ref, *refs):
        if emit_fc5:
            fc5_ref, fc6_ref, acc_ref = refs
        else:
            fc6_ref, acc_ref = refs

        k = pl.program_id(1)

        @pl.when(k == 0)
        def _():
            acc_ref[...] = jnp.zeros_like(acc_ref)

        # K-tile partial product, f32 accumulation.  astype is a no-op in the
        # f32 path and gives a native bf16 MXU pass in the bf16 path.
        x = flat_ref[...].astype(w5_ref.dtype)
        acc_ref[...] += jnp.dot(x, w5_ref[...],
                                preferred_element_type=jnp.float32)

        @pl.when(k == pl.num_programs(1) - 1)
        def _():
            b5 = vecs_ref[pl.ds(0, 1), :]          # [1, HIDDEN_PAD]
            scale = vecs_ref[pl.ds(1, 1), :]       # folded eval-mode BN scale
            shift = vecs_ref[pl.ds(2, 1), :]       # folded eval-mode BN shift

            fc5 = acc_ref[...] + b5
            if emit_fc5:
                fc5_ref[...] = fc5

            bn5 = jnp.maximum(fc5, 0.0) * scale + shift
            # dropout(p=0.5, training=False) == identity
            fc6_ref[...] = (
                jnp.dot(bn5.astype(w6_ref.dtype), w6_ref[...],
                        preferred_element_type=jnp.float32)
                + b6_ref[...])

    return kernel


# ---------------------------------------------------------------------------
# Parameter packing (done once, outside the per-call path)
# ---------------------------------------------------------------------------
def pack_params(params, *, use_bf16=False):
    """Fold eval-mode BN into scale/shift, pack small vectors, pad lane dims.

    use_bf16=True stores w5/w6 in bfloat16 (halves the dominant weight DMA and
    MXU passes) at ~1e-3 relative error vs the f32 PyTorch reference.
    """
    w5, b5 = params["w5"], params["b5"]
    gamma, beta = params["gamma"], params["beta"]
    mean, var = params["mean"], params["var"]
    w6, b6 = params["w6"], params["b6"]

    scale = gamma * jax.lax.rsqrt(var + BN_EPS)            # [1, 300]
    shift = beta - mean * scale                            # [1, 300]

    K = w5.shape[0]
    K_pad = _round_up(K, LANE)
    pad_k = K_pad - K
    pad_h = HIDDEN_PAD - HIDDEN
    pad_c = NUM_CLASSES_PAD - NUM_CLASSES

    w_dtype = jnp.bfloat16 if use_bf16 else jnp.float32

    w5_p = jnp.pad(w5, ((0, pad_k), (0, pad_h))).astype(w_dtype)   # [Kp, 384]
    vecs = jnp.concatenate([b5, scale, shift], axis=0)             # [3, 300]
    vecs_p = jnp.pad(vecs, ((0, 0), (0, pad_h)))                   # [3, 384] f32
    w6_p = jnp.pad(w6, ((0, pad_h), (0, pad_c))).astype(w_dtype)   # [384, 128]
    b6_p = jnp.pad(b6, ((0, 0), (0, pad_c)))                       # [1, 128] f32

    return {"w5": w5_p, "vecs": vecs_p, "w6": w6_p, "b6": b6_p,
            # unpadded f32 copies for wrapper-side relu5/bn5 reconstruction
            "scale": scale, "shift": shift}


# ---------------------------------------------------------------------------
# Wrapper
# ---------------------------------------------------------------------------
@functools.partial(jax.jit, static_argnames=("return_intermediates",))
def net_forward(x, packed, *, return_intermediates=True):
    """x: [B, C, H, W] float32.  Returns dict matching Net.forward keys.

    return_intermediates=False returns only 'flat' and 'fc6' (single output
    stream); the default keeps the full PyTorch dict contract.
    """
    B = x.shape[0]
    K = math.prod(x.shape[1:])
    flat = x.reshape(B, K)                                 # glue (plain JAX)

    K_pad = packed["w5"].shape[0]
    w_bytes = packed["w5"].dtype.itemsize

    tb = min(_round_up(B, SUBLANE), MAX_TB)
    B_pad = _round_up(B, tb)

    # Skip the extra HBM copy when the activation is already aligned.
    if B_pad != B or K_pad != K:
        flat_p = jnp.pad(flat, ((0, B_pad - B), (0, K_pad - K)))
    else:
        flat_p = flat

    tk = _choose_tk(K_pad, tb, w_bytes)
    nb = B_pad // tb
    nk = K_pad // tk

    in_specs = [
        pl.BlockSpec((tb, tk), lambda b, k: (b, k)),                   # flat
        pl.BlockSpec((tk, HIDDEN_PAD), lambda b, k: (k, 0)),           # w5
        pl.BlockSpec((3, HIDDEN_PAD), lambda b, k: (0, 0)),            # b5/scale/shift
        pl.BlockSpec((HIDDEN_PAD, NUM_CLASSES_PAD), lambda b, k: (0, 0)),  # w6
        pl.BlockSpec((1, NUM_CLASSES_PAD), lambda b, k: (0, 0)),       # b6
    ]
    scratch_shapes = [pltpu.VMEM((tb, HIDDEN_PAD), jnp.float32)]       # fc5 accumulator
    compiler_params = pltpu.CompilerParams(
        dimension_semantics=("parallel", "arbitrary"),
        vmem_limit_bytes=VMEM_LIMIT_BYTES)

    flops = 2 * B_pad * K_pad * HIDDEN_PAD \
        + 2 * B_pad * HIDDEN_PAD * NUM_CLASSES_PAD
    bytes_in = (B_pad * K_pad * 4
                + nb * K_pad * HIDDEN_PAD * w_bytes
                + 3 * HIDDEN_PAD * 4
                + HIDDEN_PAD * NUM_CLASSES_PAD * w_bytes
                + NUM_CLASSES_PAD * 4)

    args = (flat_p, packed["w5"], packed["vecs"], packed["w6"], packed["b6"])

    if return_intermediates:
        bytes_out = 4 * (B_pad * HIDDEN_PAD + B_pad * NUM_CLASSES_PAD)
        fc5_p, fc6_p = pl.pallas_call(
            _make_kernel(True),
            out_shape=(
                jax.ShapeDtypeStruct((B_pad, HIDDEN_PAD), jnp.float32),
                jax.ShapeDtypeStruct((B_pad, NUM_CLASSES_PAD), jnp.float32),
            ),
            grid=(nb, nk),
            in_specs=in_specs,
            out_specs=(
                pl.BlockSpec((tb, HIDDEN_PAD), lambda b, k: (b, 0)),
                pl.BlockSpec((tb, NUM_CLASSES_PAD), lambda b, k: (b, 0)),
            ),
            scratch_shapes=scratch_shapes,
            compiler_params=compiler_params,
            cost_estimate=pl.CostEstimate(
                flops=flops, transcendentals=0,
                bytes_accessed=bytes_in + bytes_out),
        )(*args)

        fc5 = fc5_p[:B, :HIDDEN]
        # relu5/bn5 reconstructed with cheap XLA elementwise ops (fused free).
        relu5 = jnp.maximum(fc5, 0.0)
        bn5 = relu5 * packed["scale"] + packed["shift"]
        return {
            "flat": flat,
            "fc5": fc5,
            "relu5": relu5,
            "bn5": bn5,
            "fc6": fc6_p[:B, :NUM_CLASSES],
        }
    else:
        bytes_out = 4 * B_pad * NUM_CLASSES_PAD
        fc6_p = pl.pallas_call(
            _make_kernel(False),
            out_shape=jax.ShapeDtypeStruct((B_pad, NUM_CLASSES_PAD),
                                           jnp.float32),
            grid=(nb, nk),
            in_specs=in_specs,
            out_specs=pl.BlockSpec((tb, NUM_CLASSES_PAD), lambda b, k: (b, 0)),
            scratch_shapes=scratch_shapes,
            compiler_params=compiler_params,
            cost_estimate=pl.CostEstimate(
                flops=flops, transcendentals=0,
                bytes_accessed=bytes_in + bytes_out),
        )(*args)
        return {
            "flat": flat,
            "fc6": fc6_p[:B, :NUM_CLASSES],
        }


# ---------------------------------------------------------------------------
# Parameter init (mimics PyTorch defaults)
# ---------------------------------------------------------------------------
def init_params(key, input_size):
    """Deterministic init mimicking PyTorch defaults (uniform +/- 1/sqrt(fan_in))."""
    k5w, k5b, k6w, k6b = jax.random.split(key, 4)

    bound5 = 1.0 / jnp.sqrt(jnp.float32(input_size))
    # PyTorch Linear stores weight as [out, in]; we store transposed [in, out]
    # so the kernel does flat @ w5 directly (same math).
    w5 = jax.random.uniform(k5w, (input_size, HIDDEN), jnp.float32,
                            -bound5, bound5)
    b5 = jax.random.uniform(k5b, (1, HIDDEN), jnp.float32, -bound5, bound5)

    bound6 = 1.0 / jnp.sqrt(jnp.float32(HIDDEN))
    w6 = jax.random.uniform(k6w, (HIDDEN, NUM_CLASSES), jnp.float32,
                            -bound6, bound6)
    b6 = jax.random.uniform(k6b, (1, NUM_CLASSES), jnp.float32,
                            -bound6, bound6)

    # BatchNorm1d(300) defaults: weight=1, bias=0, running_mean=0, running_var=1
    gamma = jnp.ones((1, HIDDEN), jnp.float32)
    beta = jnp.zeros((1, HIDDEN), jnp.float32)
    mean = jnp.zeros((1, HIDDEN), jnp.float32)
    var = jnp.ones((1, HIDDEN), jnp.float32)

    return {"w5": w5, "b5": b5, "gamma": gamma, "beta": beta,
            "mean": mean, "var": var, "w6": w6, "b6": b6}


if __name__ == "__main__":
    key = jax.random.PRNGKey(0)
    kx, kp = jax.random.split(key)

    # INPUT_SHAPE chosen as (4, 16, 16) -> input_size = 1024; batch = 2.
    B, C, H, W = 2, 4, 16, 16
    x = jax.random.normal(kx, (B, C, H, W), jnp.float32)

    params = init_params(kp, C * H * W)

    # Pure-JAX reference of the same math (eval-mode BN, no dropout).
    flat = x.reshape(B, -1)
    fc5_ref = flat @ params["w5"] + params["b5"]
    relu5_ref = jnp.maximum(fc5_ref, 0.0)
    bn5_ref = ((relu5_ref - params["mean"])
               * jax.lax.rsqrt(params["var"] + BN_EPS)
               * params["gamma"] + params["beta"])
    fc6_ref = bn5_ref @ params["w6"] + params["b6"]

    # ---- default f32 path: exact match to the PyTorch reference ----
    packed = pack_params(params, use_bf16=False)

    out = net_forward(x, packed, return_intermediates=True)
    jax.block_until_ready(out)
    out_fast = net_forward(x, packed, return_intermediates=False)
    jax.block_until_ready(out_fast)

    assert out["flat"].shape == (B, C * H * W)
    assert out["fc5"].shape == (B, HIDDEN)
    assert out["relu5"].shape == (B, HIDDEN)
    assert out["bn5"].shape == (B, HIDDEN)
    assert out["fc6"].shape == (B, NUM_CLASSES)
    assert jnp.allclose(out["fc5"], fc5_ref, atol=1e-4, rtol=1e-4)
    assert jnp.allclose(out["relu5"], relu5_ref, atol=1e-4, rtol=1e-4)
    assert jnp.allclose(out["bn5"], bn5_ref, atol=1e-4, rtol=1e-4)
    assert jnp.allclose(out["fc6"], fc6_ref, atol=1e-4, rtol=1e-4)
    assert out_fast["fc6"].shape == (B, NUM_CLASSES)
    assert jnp.allclose(out_fast["fc6"], fc6_ref, atol=1e-4, rtol=1e-4)

    # ---- opt-in bf16 weights: halved weight DMA, looser tolerance ----
    packed_bf16 = pack_params(params, use_bf16=True)
    out_bf16 = net_forward(x, packed_bf16, return_intermediates=False)
    jax.block_until_ready(out_bf16)
    assert jnp.allclose(out_bf16["fc6"], fc6_ref, atol=2e-2, rtol=2e-2)

    print("KERNEL_OK")
</pallas_src>

<mosaic_0001>
module attributes {stable_mosaic.version = 11 : i64} {
  func.func @kernel(%arg0: i32, %arg1: i32, %arg2: memref<8x1024xf32, #tpu.memory_space<vmem>>, %arg3: memref<1024x384xf32, #tpu.memory_space<vmem>>, %arg4: memref<3x384xf32, #tpu.memory_space<vmem>>, %arg5: memref<384x128xf32, #tpu.memory_space<vmem>>, %arg6: memref<1x128xf32, #tpu.memory_space<vmem>>, %arg7: memref<8x384xf32, #tpu.memory_space<vmem>>, %arg8: memref<8x128xf32, #tpu.memory_space<vmem>>, %arg9: memref<8x384xf32, #tpu.memory_space<vmem>>) attributes {dimension_semantics = [#tpu.dimension_semantics<parallel>, #tpu.dimension_semantics<arbitrary>], iteration_bounds = array<i64: 1, 1>, scalar_prefetch = 0 : i64, scratch_operands = 1 : i64, tpu.core_type = #tpu.core_type<tc>, window_params = [{transform_indices = @transform_0, window_bounds = array<i64: 8, 1024>}, {transform_indices = @transform_1, window_bounds = array<i64: 1024, 384>}, {pipeline_mode = #tpu.pipeline_mode<synchronous>, transform_indices = @transform_2, window_bounds = array<i64: 3, 384>}, {pipeline_mode = #tpu.pipeline_mode<synchronous>, transform_indices = @transform_3, window_bounds = array<i64: 384, 128>}, {pipeline_mode = #tpu.pipeline_mode<synchronous>, transform_indices = @transform_4, window_bounds = array<i64: 1, 128>}, {transform_indices = @transform_5, window_bounds = array<i64: 8, 384>}, {transform_indices = @transform_6, window_bounds = array<i64: 8, 128>}]} {
    %c0_i32 = arith.constant 0 : i32
    %0 = arith.cmpi eq, %arg1, %c0_i32 : i32
    %1 = arith.extui %0 : i1 to i32
    %c0_i32_0 = arith.constant 0 : i32
    %2 = arith.cmpi ne, %1, %c0_i32_0 : i32
    scf.if %2 {
      %cst_10 = arith.constant 0.000000e+00 : f32
      %12 = vector.broadcast %cst_10 : f32 to vector<8x384xf32>
      %c0_11 = arith.constant 0 : index
      %c0_12 = arith.constant 0 : index
      %13 = vector.load %arg9[%c0_11, %c0_12] : memref<8x384xf32, #tpu.memory_space<vmem>>, vector<8x384xf32>
      tpu.vector_store %arg9[%c0_11, %c0_12], %12 {strides = array<i32>} : memref<8x384xf32, #tpu.memory_space<vmem>>, vector<8x384xf32>,
    } else {
    }
    %c0 = arith.constant 0 : index
    %c0_1 = arith.constant 0 : index
    %3 = vector.load %arg2[%c0, %c0_1] : memref<8x1024xf32, #tpu.memory_space<vmem>>, vector<8x1024xf32>
    %c0_2 = arith.constant 0 : index
    %c0_3 = arith.constant 0 : index
    %4 = vector.load %arg9[%c0_2, %c0_3] : memref<8x384xf32, #tpu.memory_space<vmem>>, vector<8x384xf32>
    %c0_4 = arith.constant 0 : index
    %c0_5 = arith.constant 0 : index
    %5 = vector.load %arg3[%c0_4, %c0_5] : memref<1024x384xf32, #tpu.memory_space<vmem>>, vector<1024x384xf32>
    %cst = arith.constant dense<0.000000e+00> : vector<8x384xf32>
    %6 = tpu.matmul %3, %5, %cst {dimension_numbers = #tpu.dot_dimension_numbers<[1], [0], [0], [1], [0, 0, 1, 1], [], []>} : vector<8x1024xf32>, vector<1024x384xf32>, vector<8x384xf32> -> vector<8x384xf32>
    %7 = arith.addf %4, %6 : vector<8x384xf32>
    %c0_6 = arith.constant 0 : index
    %c0_7 = arith.constant 0 : index
    %8 = vector.load %arg9[%c0_6, %c0_7] : memref<8x384xf32, #tpu.memory_space<vmem>>, vector<8x384xf32>
    tpu.vector_store %arg9[%c0_6, %c0_7], %7 {strides = array<i32>} : memref<8x384xf32, #tpu.memory_space<vmem>>, vector<8x384xf32>,
    %c0_i32_8 = arith.constant 0 : i32
    %9 = arith.cmpi eq, %arg1, %c0_i32_8 : i32
    %10 = arith.extui %9 : i1 to i32
    %c0_i32_9 = arith.constant 0 : i32
    %11 = arith.cmpi ne, %10, %c0_i32_9 : i32
    scf.if %11 {
      %c0_10 = arith.constant 0 : index
      %c0_11 = arith.constant 0 : index
      %12 = vector.load %arg4[%c0_10, %c0_11] : memref<3x384xf32, #tpu.memory_space<vmem>>, vector<1x384xf32>
      %c1 = arith.constant 1 : index
      %c0_12 = arith.constant 0 : index
      %13 = vector.load %arg4[%c1, %c0_12] : memref<3x384xf32, #tpu.memory_space<vmem>>, vector<1x384xf32>
      %c2 = arith.constant 2 : index
      %c0_13 = arith.constant 0 : index
      %14 = vector.load %arg4[%c2, %c0_13] : memref<3x384xf32, #tpu.memory_space<vmem>>, vector<1x384xf32>
      %c0_14 = arith.constant 0 : index
      %c0_15 = arith.constant 0 : index
      %15 = vector.load %arg9[%c0_14, %c0_15] : memref<8x384xf32, #tpu.memory_space<vmem>>, vector<8x384xf32>
      %16 = vector.broadcast %12 : vector<1x384xf32> to vector<8x384xf32>
      %17 = arith.addf %15, %16 : vector<8x384xf32>
      %c0_16 = arith.constant 0 : index
      %c0_17 = arith.constant 0 : index
      %18 = vector.load %arg7[%c0_16, %c0_17] : memref<8x384xf32, #tpu.memory_space<vmem>>, vector<8x384xf32>
      tpu.vector_store %arg7[%c0_16, %c0_17], %17 {strides = array<i32>} : memref<8x384xf32, #tpu.memory_space<vmem>>, vector<8x384xf32>,
      %cst_18 = arith.constant 0.000000e+00 : f32
      %19 = vector.broadcast %cst_18 : f32 to vector<8x384xf32>
      %20 = arith.maximumf %17, %19 : vector<8x384xf32>
      %21 = vector.broadcast %13 : vector<1x384xf32> to vector<8x384xf32>
      %22 = arith.mulf %20, %21 : vector<8x384xf32>
      %23 = vector.broadcast %14 : vector<1x384xf32> to vector<8x384xf32>
      %24 = arith.addf %22, %23 : vector<8x384xf32>
      %c0_19 = arith.constant 0 : index
      %c0_20 = arith.constant 0 : index
      %25 = vector.load %arg5[%c0_19, %c0_20] : memref<384x128xf32, #tpu.memory_space<vmem>>, vector<384x128xf32>
      %cst_21 = arith.constant dense<0.000000e+00> : vector<8x128xf32>
      %26 = tpu.matmul %24, %25, %cst_21 {dimension_numbers = #tpu.dot_dimension_numbers<[1], [0], [0], [1], [0, 0, 1, 1], [], []>} : vector<8x384xf32>, vector<384x128xf32>, vector<8x128xf32> -> vector<8x128xf32>
      %c0_22 = arith.constant 0 : index
      %c0_23 = arith.constant 0 : index
      %27 = vector.load %arg6[%c0_22, %c0_23] : memref<1x128xf32, #tpu.memory_space<vmem>>, vector<1x128xf32>
      %28 = vector.broadcast %27 : vector<1x128xf32> to vector<8x128xf32>
      %29 = arith.addf %26, %28 : vector<8x128xf32>
      %c0_24 = arith.constant 0 : index
      %c0_25 = arith.constant 0 : index
      %30 = vector.load %arg8[%c0_24, %c0_25] : memref<8x128xf32, #tpu.memory_space<vmem>>, vector<8x128xf32>
      tpu.vector_store %arg8[%c0_24, %c0_25], %29 {strides = array<i32>} : memref<8x128xf32, #tpu.memory_space<vmem>>, vector<8x128xf32>,
    } else {
    }
    return
  }
  func.func @transform_0(%arg0: i32, %arg1: i32) -> (i32, i32) {
    %c0_i32 = arith.constant 0 : i32
    return %arg0, %arg1 : i32, i32
  }
  func.func @transform_1(%arg0: i32, %arg1: i32) -> (i32, i32) {
    %c0_i32 = arith.constant 0 : i32
    %c0_i32_0 = arith.constant 0 : i32
    return %arg1, %c0_i32 : i32, i32
  }
  func.func @transform_2(%arg0: i32, %arg1: i32) -> (i32, i32) {
    %c0_i32 = arith.constant 0 : i32
    %c0_i32_0 = arith.constant 0 : i32
    %c0_i32_1 = arith.constant 0 : i32
    return %c0_i32, %c0_i32_0 : i32, i32
  }
  func.func @transform_3(%arg0: i32, %arg1: i32) -> (i32, i32) {
    %c0_i32 = arith.constant 0 : i32
    %c0_i32_0 = arith.constant 0 : i32
    %c0_i32_1 = arith.constant 0 : i32
    return %c0_i32, %c0_i32_0 : i32, i32
  }
  func.func @transform_4(%arg0: i32, %arg1: i32) -> (i32, i32) {
    %c0_i32 = arith.constant 0 : i32
    %c0_i32_0 = arith.constant 0 : i32
    %c0_i32_1 = arith.constant 0 : i32
    return %c0_i32, %c0_i32_0 : i32, i32
  }
  func.func @transform_5(%arg0: i32, %arg1: i32) -> (i32, i32) {
    %c0_i32 = arith.constant 0 : i32
    %c0_i32_0 = arith.constant 0 : i32
    return %arg0, %c0_i32 : i32, i32
  }
  func.func @transform_6(%arg0: i32, %arg1: i32) -> (i32, i32) {
    %c0_i32 = arith.constant 0 : i32
    %c0_i32_0 = arith.constant 0 : i32
    return %arg0, %c0_i32 : i32, i32
  }
}

</mosaic_0001>

<bundles_post_ra>
// kernel: net_forward.1
= control target key start
LH: loop header
LB: loop body
LE: loop exit
PB: predicated region body
PF: predicated region fallthrough
CT: control target
= control target key end

     0   :  { %12 = vsyncpa [#allocation4], 0  ;;  %s2273_s0 = inlined_call_operand.vmem [shape: f32[8,1024], index: 0, kind: input, shape index: {}]   ;;  %s2274_s1 = inlined_call_operand.hbm [shape: f32[1024,384], index: 1, kind: input, shape index: {}]   ;;  %s2275_s2 = inlined_call_operand.hbm [shape: f32[3,384], index: 2, kind: input, shape index: {}]   ;;  %s2276_s3 = inlined_call_operand.hbm [shape: f32[384,128], index: 3, kind: input, shape index: {}]   ;;  %s2277_s4 = inlined_call_operand.hbm [shape: f32[1,128], index: 4, kind: input, shape index: {}]   ;;  %s2278_s5 = inlined_call_operand.vmem [shape: f32[8,384], index: 5, kind: output, shape index: {0}]   ;;  %s2279_s6 = inlined_call_operand.vmem [shape: f32[8,128], index: 6, kind: output, shape index: {1}]  }
   0x1   :  { %13 = vsyncpa [#allocation6], 0 }
   0x2   :  { %14 = vsyncpa [#allocation9], 0  ;;  %s2105_s21 = smov [#allocation5]   ;;  %s2106_s23 = smov [#allocation3]  }
   0x3   :  { %s35_s22 = sshll.u32 %s2105_s21, 4  ;;  %s22_s24 = sshll.u32 %s2106_s23, 4  ;;  %s36_s22 = int_to_ptr.vmem [resolvable:$true] %s35_s22  ;;  %s2151_s24 = int_to_ptr.vmem [resolvable:$true] %s22_s24 }
   0x4   :  { %s2011_s27 = scalar_lea.hbm %s2275_s2, 192 }
   0x5   :  { %p2012_p0 = scmp.ne.s32.totalorder %s2275_s2, %s2011_s27  ;;  %p2015_p1 = scmp.lt.u32.totalorder %s2011_s27, %s2275_s2 }
   0x7   :  { %p2017_p2 = pnand %p2015_p1, %p2012_p0 }
   0x9   :  { %2020 = shalt.err (!%p2017_p2)
}
   0xa   :  { %s2021_s8 = scalar_lea.vmem %s36_s22, 192  ;;  %p2026_p4 = scmp.lt.s32.totalorder %s36_s22, %s36_s22 }
   0xb   :  { %p2022_p3 = scmp.ne.s32.totalorder %s36_s22, %s2021_s8  ;;  %p2027_p5 = scmp.lt.s32.totalorder %s2021_s8, %s2021_s8 }
   0xd   :  { %p2028_p6 = por %p2027_p5, %p2026_p4 }
   0xf   :  { %p2029_p7 = pnand %p2028_p6, %p2022_p3 }
  0x11   :  { %2032 = shalt.err (!%p2029_p7)
}
  0x12   :  { %38 = dma.hbm_to_vmem [thread:$0]  %s2275_s2, 192, %s36_s22, [#allocation6]  }
  0x13   :  { %s2033_s13 = scalar_lea.hbm %s2274_s1, 49152 }
  0x14   :  { %p2034_p8 = scmp.ne.s32.totalorder %s2274_s1, %s2033_s13  ;;  %p2037_p9 = scmp.lt.u32.totalorder %s2033_s13, %s2274_s1 }
  0x16   :  { %p2039_p10 = pnand %p2037_p9, %p2034_p8 }
  0x18   :  { %2042 = shalt.err (!%p2039_p10)
}
  0x19   :  { %s2043_s18 = scalar_lea.vmem %s2151_s24, 49152  ;;  %p2048_p12 = scmp.lt.s32.totalorder %s2151_s24, %s2151_s24 }
  0x1a   :  { %p2044_p11 = scmp.ne.s32.totalorder %s2151_s24, %s2043_s18  ;;  %p2049_p13 = scmp.lt.s32.totalorder %s2043_s18, %s2043_s18 }
  0x1c   :  { %p2050_p0 = por %p2049_p13, %p2048_p12 }
  0x1e   :  { %p2051_p1 = pnand %p2050_p0, %p2044_p11 }
  0x20   :  { %2054 = shalt.err (!%p2051_p1)
}
  0x21   :  { %s2107_s2 = smov 384   ;;  %s2108_s19 = smov 24  }
  0x22   :  { %28 = dma.hbm_to_vmem [thread:$0]  %s2274_s1, 49152, %s2151_s24, [#allocation4], %s2107_s2, %s2107_s2, %s2108_s19  }
  0x23   :  { %s2109_s22 = smov [#allocation7]   ;;  %s2055_s27 = scalar_lea.hbm %s2276_s3, 6144 }
  0x24   :  { %s44_s23 = sshll.u32 %s2109_s22, 4  ;;  %p2056_p2 = scmp.ne.s32.totalorder %s2276_s3, %s2055_s27  ;;  %s45_s23 = int_to_ptr.vmem [resolvable:$true] %s44_s23 }
  0x25   :  { %p2059_p3 = scmp.lt.u32.totalorder %s2055_s27, %s2276_s3 }
  0x27   :  { %p2061_p4 = pnand %p2059_p3, %p2056_p2 }
  0x29   :  { %2064 = shalt.err (!%p2061_p4)
}
  0x2a   :  { %s2065_s8 = scalar_lea.vmem %s45_s23, 6144  ;;  %p2070_p6 = scmp.lt.s32.totalorder %s45_s23, %s45_s23 }
  0x2b   :  { %p2066_p5 = scmp.ne.s32.totalorder %s45_s23, %s2065_s8  ;;  %p2071_p7 = scmp.lt.s32.totalorder %s2065_s8, %s2065_s8 }
  0x2d   :  { %p2072_p8 = por %p2071_p7, %p2070_p6 }
  0x2f   :  { %p2073_p9 = pnand %p2072_p8, %p2066_p5 }
  0x31   :  { %2076 = shalt.err (!%p2073_p9)
}
  0x32   :  { %s2110_s1 = smov 128   ;;  %s2111_s24 = smov 8  }
  0x33   :  { %50 = dma.hbm_to_vmem [thread:$0]  %s2276_s3, 6144, %s45_s23, [#allocation6], %s2110_s1, %s2110_s1, %s2111_s24  }
  0x34   :  { %s2112_s11 = smov [#allocation8]   ;;  %s2077_s15 = scalar_lea.hbm %s2277_s4, 16 }
  0x35   :  { %s57_s12 = sshll.u32 %s2112_s11, 4  ;;  %p2078_p10 = scmp.ne.s32.totalorder %s2277_s4, %s2077_s15  ;;  %s58_s12 = int_to_ptr.vmem [resolvable:$true] %s57_s12 }
  0x36   :  { %p2081_p11 = scmp.lt.u32.totalorder %s2077_s15, %s2277_s4 }
  0x38   :  { %p2083_p12 = pnand %p2081_p11, %p2078_p10 }
  0x3a   :  { %2086 = shalt.err (!%p2083_p12)
}
  0x3b   :  { %s2087_s19 = scalar_lea.vmem %s58_s12, 16  ;;  %s2091_s3 = scalar_lea.vmem %s58_s12, 32 }
  0x3c   :  { %p2088_p13 = scmp.ne.s32.totalorder %s58_s12, %s2087_s19  ;;  %p2092_p0 = scmp.lt.s32.totalorder %s58_s12, %s58_s12 }
  0x3d   :  { %p2093_p1 = scmp.lt.s32.totalorder %s2091_s3, %s2087_s19 }
  0x3f   :  { %p2094_p2 = por %p2093_p1, %p2092_p0 }
  0x41   :  { %p2095_p3 = pnand %p2094_p2, %p2088_p13 }
  0x43   :  { %2098 = shalt.err (!%p2095_p3)
}
  0x44   :  { %60 = dma.hbm_to_vmem [thread:$0]  %s2277_s4, 16, %s58_s12, [#allocation9]  }
  0x45   :  { %2099 = dma.done.wait [#allocation4], 49152  }
  0x46   :  { %2100 = vsyncadd [#allocation4], 4294918144 }
  0x47   :  { %2101 = dma.done.wait [#allocation6], 6336  }
  0x48   :  { %2102 = vsyncadd [#allocation6], 4294960960 }
  0x49   :  { %2103 = dma.done.wait [#allocation9], 16  }
  0x4a   :  { %2104 = vsyncadd [#allocation9], 4294967280  ;;  %v92_v0 = vld [vmem:[#allocation3 + $0x8] sm:$0xff]  ;;  %v95_v1 = vld [vmem:[#allocation3 + $0x20] sm:$0xff]  ;;  %vm2114_vm0 = vmmov 0  }
  0x4b   :  { %v91_v2 = vld [vmem:[#allocation3] sm:$0xff]  ;;  %v1554_v3 = vpack.c.bf16 %v95_v1, %v92_v0  ;;  %v94_v4 = vld [vmem:[#allocation3 + $0x18] sm:$0xff]  ;;  %v101_v6 = vld [vmem:[#allocation3 + $0x50] sm:$0xff] }
  0x4c   :  { %v98_v5 = vld [vmem:[#allocation3 + $0x38] sm:$0xff]  ;;  %v1556_v7 = vpack.c.bf16 %v94_v4, %v91_v2  ;;  %v97_v9 = vld [vmem:[#allocation3 + $0x30] sm:$0xff]  ;;  %v100_v10 = vld [vmem:[#allocation3 + $0x48] sm:$0xff] }
  0x4d   :  { %v1558_v8 = vpack.c.bf16 %v101_v6, %v98_v5  ;;  %v104_v11 = vld [vmem:[#allocation3 + $0x68] sm:$0xff]  ;;  %1555 = vmatprep.subr.bf16.mxu0 %v1554_v3  ;;  %v107_v12 = vld [vmem:[#allocation3 + $0x80] sm:$0xff]  ;;  %v1560_v13 = vpack.c.bf16 %v100_v10, %v97_v9  ;;  %v106_v16 = vld [vmem:[#allocation3 + $0x78] sm:$0xff] }
  0x4e   :  { %1557 = vmatpush1.bf16.msra.mxu0 %v1556_v7  ;;  %v1562_v14 = vpack.c.bf16 %v107_v12, %v104_v11  ;;  %v103_v15 = vld [vmem:[#allocation3 + $0x60] sm:$0xff]  ;;  %v110_v17 = vld [vmem:[#allocation3 + $0x98] sm:$0xff]  ;;  %v113_v18 = vld [vmem:[#allocation3 + $0xb0] sm:$0xff] }
  0x4f   :  { %1559 = vmatprep.subr.bf16.mxu0 %v1558_v8  ;;  %v1564_v19 = vpack.c.bf16 %v106_v16, %v103_v15  ;;  %v1566_v20 = vpack.c.bf16 %v113_v18, %v110_v17  ;;  %v109_v21 = vld [vmem:[#allocation3 + $0x90] sm:$0xff]  ;;  %v112_v22 = vld [vmem:[#allocation3 + $0xa8] sm:$0xff]  ;;  %v119_v24 = vld [vmem:[#allocation3 + $0xe0] sm:$0xff] }
  0x50   :  { %v116_v23 = vld [vmem:[#allocation3 + $0xc8] sm:$0xff]  ;;  %v1568_v25 = vpack.c.bf16 %v112_v22, %v109_v21  ;;  %v115_v27 = vld [vmem:[#allocation3 + $0xc0] sm:$0xff]  ;;  %v118_v28 = vld [vmem:[#allocation3 + $0xd8] sm:$0xff] }
  0x51   :  { %v1570_v26 = vpack.c.bf16 %v119_v24, %v116_v23  ;;  %v122_v29 = vld [vmem:[#allocation3 + $0xf8] sm:$0xff]  ;;  %v125_v30 = vld [vmem:[#allocation3 + $0x110] sm:$0xff]  ;;  %v1572_v31 = vpack.c.bf16 %v118_v28, %v115_v27  ;;  %v124_v34 = vld [vmem:[#allocation3 + $0x108] sm:$0xff] }
  0x52   :  { %1561 = vmatpush1.bf16.msra.mxu0 %v1560_v13  ;;  %v1574_v32 = vpack.c.bf16 %v125_v30, %v122_v29  ;;  %v121_v33 = vld [vmem:[#allocation3 + $0xf0] sm:$0xff]  ;;  %v128_v35 = vld [vmem:[#allocation3 + $0x128] sm:$0xff]  ;;  %v131_v36 = vld [vmem:[#allocation3 + $0x140] sm:$0xff] }
  0x53   :  { %1563 = vmatprep.subr.bf16.mxu0 %v1562_v14  ;;  %v1576_v37 = vpack.c.bf16 %v124_v34, %v121_v33  ;;  %v127_v38 = vld [vmem:[#allocation3 + $0x120] sm:$0xff]  ;;  %v1578_v39 = vpack.c.bf16 %v131_v36, %v128_v35  ;;  %v130_v40 = vld [vmem:[#allocation3 + $0x138] sm:$0xff]  ;;  %v81_v42 = vld [vmem:[%s2273_s0 + $0x8] sm:$0xff] }
  0x54   :  { %v134_v41 = vld [vmem:[#allocation3 + $0x158] sm:$0xff]  ;;  %v137_v43 = vld [vmem:[#allocation3 + $0x170] sm:$0xff]  ;;  %539 = vmatprep.mubr.f32.mxu0 %v81_v42  ;;  %v144_v45 = vld [vmem:[#allocation3 + $0x1a8] sm:$0xff]  ;;  %823 = vmatprep.mubr.f32.mxu1 %v81_v42  ;;  %v1580_v47 = vpack.c.bf16 %v130_v40, %v127_v38 }
  0x55   :  { %v141_v44 = vld [vmem:[#allocation3 + $0x190] sm:$0xff]  ;;  %v96_v50 = vld [vmem:[#allocation3 + $0x28] sm:$0xff]  ;;  %v1582_v51 = vpack.c.bf16 %v137_v43, %v134_v41  ;;  %v147_v54 = vld [vmem:[#allocation3 + $0x1c0] sm:$0xff] }
  0x56   :  { %1565 = vmatpush1.bf16.msra.mxu0 %v1564_v19  ;;  %v1810_v46 = vpack.c.bf16 %v144_v45, %v141_v44  ;;  %v133_v48 = vld [vmem:[#allocation3 + $0x150] sm:$0xff]  ;;  %v136_v52 = vld [vmem:[#allocation3 + $0x168] sm:$0xff]  ;;  %v150_v55 = vld [vmem:[#allocation3 + $0x1d8] sm:$0xff] }
  0x57   :  { %1567 = vmatprep.subr.bf16.mxu0 %v1566_v20  ;;  %v93_v49 = vld [vmem:[#allocation3 + $0x10] sm:$0xff]  ;;  %v140_v56 = vld [vmem:[#allocation3 + $0x188] sm:$0xff]  ;;  %v143_v57 = vld [vmem:[#allocation3 + $0x1a0] sm:$0xff]  ;;  %v1814_v58 = vpack.c.bf16 %v150_v55, %v147_v54  ;;  %v1584_v61 = vpack.c.bf16 %v136_v52, %v133_v48 }
  0x58   :  { %1811 = vmatprep.subr.bf16.mxu1 %v1810_v46  ;;  %v1812_v53 = vpack.c.bf16 %v96_v50, %v93_v49  ;;  %v99_v59 = vld [vmem:[#allocation3 + $0x40] sm:$0xff]  ;;  %v102_v60 = vld [vmem:[#allocation3 + $0x58] sm:$0xff]  ;;  %v153_v0 = vld [vmem:[#allocation3 + $0x1f0] sm:$0xff]  ;;  %v1586_v2 = vpack.c.bf16 %v143_v57, %v140_v56 }
  0x59   :  { %v139_v62 = vld [vmem:[#allocation3 + $0x180] sm:$0xff]  ;;  %v1816_v63 = vpack.c.bf16 %v102_v60, %v99_v59  ;;  %v156_v1 = vld [vmem:[#allocation3 + $0x208] sm:$0xff]  ;;  %v142_v3 = vld [vmem:[#allocation3 + $0x198] sm:$0xff] }
  0x5a   :  { %1569 = vmatpush1.bf16.msra.mxu0 %v1568_v25  ;;  %1813 = vmatpush3.bf16.msra.mxu1 %v1812_v53  ;;  %v1818_v4 = vpack.c.bf16 %v156_v1, %v153_v0  ;;  %v105_v5 = vld [vmem:[#allocation3 + $0x70] sm:$0xff]  ;;  %v108_v6 = vld [vmem:[#allocation3 + $0x88] sm:$0xff]  ;;  %v146_v7 = vld [vmem:[#allocation3 + $0x1b8] sm:$0xff]  ;;  %v1588_v12 = vpack.c.bf16 %v142_v3, %v139_v62 }
  0x5b   :  { %1571 = vmatprep.subr.bf16.mxu0 %v1570_v26  ;;  %1815 = vmatprep.subr.bf16.mxu1 %v1814_v58  ;;  %v149_v8 = vld [vmem:[#allocation3 + $0x1d0] sm:$0xff]  ;;  %v159_v9 = vld [vmem:[#allocation3 + $0x220] sm:$0xff]  ;;  %v1820_v10 = vpack.c.bf16 %v108_v6, %v105_v5  ;;  %v162_v11 = vld [vmem:[#allocation3 + $0x238] sm:$0xff] }
  0x5c   :  { %v145_v13 = vld [vmem:[#allocation3 + $0x1b0] sm:$0xff]  ;;  %v1822_v14 = vpack.c.bf16 %v162_v11, %v159_v9  ;;  %v111_v15 = vld [vmem:[#allocation3 + $0xa0] sm:$0xff]  ;;  %v114_v16 = vld [vmem:[#allocation3 + $0xb8] sm:$0xff]  ;;  %v1590_v17 = vpack.c.bf16 %v149_v8, %v146_v7 }
  0x5d   :  { %v148_v18 = vld [vmem:[#allocation3 + $0x1c8] sm:$0xff]  ;;  %v165_v19 = vld [vmem:[#allocation3 + $0x250] sm:$0xff]  ;;  %v155_v22 = vld [vmem:[#allocation3 + $0x200] sm:$0xff]  ;;  %v1824_v23 = vpack.c.bf16 %v114_v16, %v111_v15 }
  0x5e   :  { %1573 = vmatpush1.bf16.msra.mxu0 %v1572_v31  ;;  %1817 = vmatpush3.bf16.msra.mxu1 %v1816_v63  ;;  %v168_v20 = vld [vmem:[#allocation3 + $0x268] sm:$0xff]  ;;  %v1592_v24 = vpack.c.bf16 %v148_v18, %v145_v13  ;;  %v151_v25 = vld [vmem:[#allocation3 + $0x1e0] sm:$0xff]  ;;  %v117_v27 = vld [vmem:[#allocation3 + $0xd0] sm:$0xff] }
  0x5f   :  { %1575 = vmatprep.subr.bf16.mxu0 %v1574_v32  ;;  %1819 = vmatprep.subr.bf16.mxu1 %v1818_v4  ;;  %v152_v21 = vld [vmem:[#allocation3 + $0x1e8] sm:$0xff]  ;;  %v1826_v26 = vpack.c.bf16 %v168_v20, %v165_v19  ;;  %v154_v30 = vld [vmem:[#allocation3 + $0x1f8] sm:$0xff]  ;;  %v171_v31 = vld [vmem:[#allocation3 + $0x280] sm:$0xff] }
  0x60   :  { %v120_v28 = vld [vmem:[#allocation3 + $0xe8] sm:$0xff]  ;;  %v1594_v29 = vpack.c.bf16 %v155_v22, %v152_v21  ;;  %v174_v32 = vld [vmem:[#allocation3 + $0x298] sm:$0xff]  ;;  %v161_v34 = vld [vmem:[#allocation3 + $0x230] sm:$0xff]  ;;  %v1596_v36 = vpack.c.bf16 %v154_v30, %v151_v25 }
  0x61   :  { %v158_v33 = vld [vmem:[#allocation3 + $0x218] sm:$0xff]  ;;  %v1828_v35 = vpack.c.bf16 %v120_v28, %v117_v27  ;;  %v1830_v38 = vpack.c.bf16 %v174_v32, %v171_v31  ;;  %v160_v42 = vld [vmem:[#allocation3 + $0x228] sm:$0xff]  ;;  %v177_v43 = vld [vmem:[#allocation3 + $0x2b0] sm:$0xff] }
  0x62   :  { %1577 = vmatpush1.bf16.msra.mxu0 %v1576_v37  ;;  %1821 = vmatpush3.bf16.msra.mxu1 %v1820_v10  ;;  %v157_v37 = vld [vmem:[#allocation3 + $0x210] sm:$0xff]  ;;  %v126_v40 = vld [vmem:[#allocation3 + $0x118] sm:$0xff]  ;;  %v1598_v41 = vpack.c.bf16 %v161_v34, %v158_v33  ;;  %v180_v44 = vld [vmem:[#allocation3 + $0x2c8] sm:$0xff] }
  0x63   :  { %1579 = vmatprep.subr.bf16.mxu0 %v1578_v39  ;;  %1823 = vmatprep.subr.bf16.mxu1 %v1822_v14  ;;  %v123_v39 = vld [vmem:[#allocation3 + $0x100] sm:$0xff]  ;;  %v164_v45 = vld [vmem:[#allocation3 + $0x248] sm:$0xff]  ;;  %v1600_v48 = vpack.c.bf16 %v160_v42, %v157_v37  ;;  %v1834_v50 = vpack.c.bf16 %v180_v44, %v177_v43  ;;  %v166_v54 = vld [vmem:[#allocation3 + $0x258] sm:$0xff] }
  0x64   :  { %v167_v46 = vld [vmem:[#allocation3 + $0x260] sm:$0xff]  ;;  %v132_v52 = vld [vmem:[#allocation3 + $0x148] sm:$0xff]  ;;  %v186_v56 = vld [vmem:[#allocation3 + $0x2f8] sm:$0xff] }
  0x65   :  { %v163_v49 = vld [vmem:[#allocation3 + $0x240] sm:$0xff]  ;;  %v1602_v53 = vpack.c.bf16 %v167_v46, %v164_v45  ;;  %v170_v57 = vld [vmem:[#allocation3 + $0x278] sm:$0xff]  ;;  %v173_v58 = vld [vmem:[#allocation3 + $0x290] sm:$0xff] }
  0x66   :  { %1581 = vmatpush1.bf16.msra.mxu0 %v1580_v47  ;;  %1825 = vmatpush3.bf16.msra.mxu1 %v1824_v23  ;;  %v1832_v47 = vpack.c.bf16 %v126_v40, %v123_v39  ;;  %v183_v55 = vld [vmem:[#allocation3 + $0x2e0] sm:$0xff]  ;;  %v1604_v60 = vpack.c.bf16 %v166_v54, %v163_v49  ;;  %v138_v0 = vld [vmem:[#allocation3 + $0x178] sm:$0xff]  ;;  %v1606_v1 = vpack.c.bf16 %v173_v58, %v170_v57  ;;  %v237_v3 = vld [vmem:[#allocation3 + $0x490] sm:$0xff] }
  0x67   :  { %1583 = vmatprep.subr.bf16.mxu0 %v1582_v51  ;;  %1827 = vmatprep.subr.bf16.mxu1 %v1826_v26  ;;  %v129_v51 = vld [vmem:[#allocation3 + $0x130] sm:$0xff]  ;;  %v1838_v62 = vpack.c.bf16 %v186_v56, %v183_v55  ;;  %v135_v63 = vld [vmem:[#allocation3 + $0x160] sm:$0xff]  ;;  %v240_v4 = vld [vmem:[#allocation3 + $0x4a8] sm:$0xff] }
  0x68   :  { %v1836_v59 = vpack.c.bf16 %v132_v52, %v129_v51  ;;  %v176_v5 = vld [vmem:[#allocation3 + $0x2a8] sm:$0xff]  ;;  %v179_v6 = vld [vmem:[#allocation3 + $0x2c0] sm:$0xff]  ;;  %v1840_v7 = vpack.c.bf16 %v138_v0, %v135_v63  ;;  %v1842_v10 = vpack.c.bf16 %v240_v4, %v237_v3  ;;  %v189_v11 = vld [vmem:[#allocation3 + $0x310] sm:$0xff] }
  0x69   :  { %v175_v9 = vld [vmem:[#allocation3 + $0x2a0] sm:$0xff]  ;;  %v1610_v13 = vpack.c.bf16 %v179_v6, %v176_v5  ;;  %v178_v14 = vld [vmem:[#allocation3 + $0x2b8] sm:$0xff]  ;;  %v185_v18 = vld [vmem:[#allocation3 + $0x2f0] sm:$0xff] }
  0x6a   :  { %1585 = vmatpush1.bf16.msra.mxu0 %v1584_v61  ;;  %1829 = vmatpush3.bf16.msra.mxu1 %v1828_v35  ;;  %v169_v61 = vld [vmem:[#allocation3 + $0x270] sm:$0xff]  ;;  %v243_v15 = vld [vmem:[#allocation3 + $0x4c0] sm:$0xff]  ;;  %v246_v16 = vld [vmem:[#allocation3 + $0x4d8] sm:$0xff]  ;;  %v1612_v21 = vpack.c.bf16 %v178_v14, %v175_v9 }
  0x6b   :  { %1587 = vmatprep.subr.bf16.mxu0 %v1586_v2  ;;  %1831 = vmatprep.subr.bf16.mxu1 %v1830_v38  ;;  %v172_v2 = vld [vmem:[#allocation3 + $0x288] sm:$0xff]  ;;  %v181_v19 = vld [vmem:[#allocation3 + $0x2d0] sm:$0xff]  ;;  %v1846_v23 = vpack.c.bf16 %v246_v16, %v243_v15  ;;  %v198_v25 = vld [vmem:[#allocation3 + $0x358] sm:$0xff] }
  0x6c   :  { %v1608_v8 = vpack.c.bf16 %v172_v2, %v169_v61  ;;  %v184_v22 = vld [vmem:[#allocation3 + $0x2e8] sm:$0xff]  ;;  %v80_v27 = vld [vmem:[%s2273_s0] sm:$0xff]  ;;  %v249_v28 = vld [vmem:[#allocation3 + $0x4f0] sm:$0xff] }
  0x6d   :  { %v188_v30 = vld [vmem:[#allocation3 + $0x308] sm:$0xff]  ;;  %v191_v31 = vld [vmem:[#allocation3 + $0x320] sm:$0xff]  ;;  %v1616_v33 = vpack.c.bf16 %v184_v22, %v181_v19  ;;  %v190_v39 = vld [vmem:[#allocation3 + $0x318] sm:$0xff] }
  0x6e   :  { %1589 = vmatpush1.bf16.msra.mxu0 %v1588_v12  ;;  %1833 = vmatpush3.bf16.msra.mxu1 %v1832_v47  ;;  %v192_v12 = vld [vmem:[#allocation3 + $0x328] sm:$0xff]  ;;  %v187_v34 = vld [vmem:[#allocation3 + $0x300] sm:$0xff]  ;;  %v1618_v38 = vpack.c.bf16 %v191_v31, %v188_v30  ;;  %v194_v42 = vld [vmem:[#allocation3 + $0x338] sm:$0xff] }
  0x6f   :  { %1591 = vmatprep.subr.bf16.mxu0 %v1590_v17  ;;  %1835 = vmatprep.subr.bf16.mxu1 %v1834_v50  ;;  %v182_v17 = vld [vmem:[#allocation3 + $0x2d8] sm:$0xff]  ;;  %v1844_v20 = vpack.c.bf16 %v192_v12, %v189_v11  ;;  %v204_v37 = vld [vmem:[#allocation3 + $0x388] sm:$0xff]  ;;  %v255_v40 = vld [vmem:[#allocation3 + $0x520] sm:$0xff]  ;;  %v1620_v46 = vpack.c.bf16 %v190_v39, %v187_v34 }
  0x70   :  { %v1614_v26 = vpack.c.bf16 %v185_v18, %v182_v17  ;;  %v197_v43 = vld [vmem:[#allocation3 + $0x350] sm:$0xff]  ;;  %v210_v49 = vld [vmem:[#allocation3 + $0x3b8] sm:$0xff]  ;;  %v196_v52 = vld [vmem:[#allocation3 + $0x348] sm:$0xff] }
  0x71   :  { %v193_v44 = vld [vmem:[#allocation3 + $0x330] sm:$0xff]  ;;  %v83_v50 = vld [vmem:[%s2273_s0 + $0x18] sm:$0xff]  ;;  %v1622_v51 = vpack.c.bf16 %v197_v43, %v194_v42  ;;  %v264_v54 = vld [vmem:[#allocation3 + $0x568] sm:$0xff] }
  0x72   :  { %1593 = vmatpush1.bf16.msra.mxu0 %v1592_v24  ;;  %1837 = vmatpush3.bf16.msra.mxu1 %v1836_v59  ;;  %v195_v24 = vld [vmem:[#allocation3 + $0x340] sm:$0xff]  ;;  %v200_v55 = vld [vmem:[#allocation3 + $0x368] sm:$0xff]  ;;  %v1624_v58 = vpack.c.bf16 %v196_v52, %v193_v44  ;;  %v213_v61 = vld [vmem:[#allocation3 + $0x3d0] sm:$0xff] }
  0x73   :  { %1595 = vmatprep.subr.bf16.mxu0 %v1594_v29  ;;  %1839 = vmatprep.subr.bf16.mxu1 %v1838_v62  ;;  %v252_v29 = vld [vmem:[#allocation3 + $0x508] sm:$0xff]  ;;  %v1848_v32 = vpack.c.bf16 %v198_v25, %v195_v24  ;;  %v203_v56 = vld [vmem:[#allocation3 + $0x380] sm:$0xff]  ;;  %v202_v0 = vld [vmem:[#allocation3 + $0x378] sm:$0xff] }
  0x74   :  { %v1850_v35 = vpack.c.bf16 %v252_v29, %v249_v28  ;;  %v199_v59 = vld [vmem:[#allocation3 + $0x360] sm:$0xff]  ;;  %v216_v62 = vld [vmem:[#allocation3 + $0x3e8] sm:$0xff]  ;;  %v1626_v63 = vpack.c.bf16 %v203_v56, %v200_v55  ;;  %v270_v2 = vld [vmem:[#allocation3 + $0x598] sm:$0xff] }
  0x75   :  { %v206_v3 = vld [vmem:[#allocation3 + $0x398] sm:$0xff]  ;;  %v209_v4 = vld [vmem:[#allocation3 + $0x3b0] sm:$0xff]  ;;  %v1860_v5 = vpack.c.bf16 %v216_v62, %v213_v61  ;;  %v1628_v6 = vpack.c.bf16 %v202_v0, %v199_v59  ;;  %v219_v9 = vld [vmem:[#allocation3 + $0x400] sm:$0xff] }
  0x76   :  { %1597 = vmatpush1.bf16.msra.mxu0 %v1596_v36  ;;  %1841 = vmatpush3.bf16.msra.mxu1 %v1840_v7  ;;  %v201_v36 = vld [vmem:[#allocation3 + $0x370] sm:$0xff]  ;;  %v1630_v11 = vpack.c.bf16 %v209_v4, %v206_v3  ;;  %v208_v12 = vld [vmem:[#allocation3 + $0x3a8] sm:$0xff]  ;;  %v215_v16 = vld [vmem:[#allocation3 + $0x3e0] sm:$0xff] }
  0x77   :  { %1599 = vmatprep.subr.bf16.mxu0 %v1598_v41  ;;  %1843 = vmatprep.subr.bf16.mxu1 %v1842_v10  ;;  %v258_v41 = vld [vmem:[#allocation3 + $0x538] sm:$0xff]  ;;  %v1852_v45 = vpack.c.bf16 %v204_v37, %v201_v36  ;;  %v205_v7 = vld [vmem:[#allocation3 + $0x390] sm:$0xff]  ;;  %v276_v14 = vld [vmem:[#allocation3 + $0x5c8] sm:$0xff] }
  0x78   :  { %v1854_v47 = vpack.c.bf16 %v258_v41, %v255_v40  ;;  %v222_v10 = vld [vmem:[#allocation3 + $0x418] sm:$0xff]  ;;  %v212_v15 = vld [vmem:[#allocation3 + $0x3c8] sm:$0xff]  ;;  %v1632_v18 = vpack.c.bf16 %v208_v12, %v205_v7  ;;  %v211_v19 = vld [vmem:[#allocation3 + $0x3c0] sm:$0xff] }
  0x79   :  { %824 = vmatmul.mubr.f32.vlgmr.msra.gmra.mrb[0].mxu1 %v80_v27  ;;  %v1864_v17 = vpack.c.bf16 %v222_v10, %v219_v9  ;;  %v228_v22 = vld [vmem:[#allocation3 + $0x448] sm:$0xff]  ;;  %v214_v24 = vld [vmem:[#allocation3 + $0x3d8] sm:$0xff]  ;;  %v279_v25 = vld [vmem:[#allocation3 + $0x5e0] sm:$0xff] }
  0x7a   :  { %1601 = vmatpush1.bf16.msra.mxu0 %v1600_v48  ;;  %1845 = vmatpush3.bf16.msra.mxu1 %v1844_v20  ;;  %v207_v48 = vld [vmem:[#allocation3 + $0x3a0] sm:$0xff]  ;;  %v221_v28 = vld [vmem:[#allocation3 + $0x410] sm:$0xff]  ;;  %v1636_v30 = vpack.c.bf16 %v214_v24, %v211_v19  ;;  %v234_v34 = vld [vmem:[#allocation3 + $0x478] sm:$0xff] }
  0x7b   :  { %1603 = vmatprep.subr.bf16.mxu0 %v1602_v53  ;;  %1847 = vmatprep.subr.bf16.mxu1 %v1846_v23  ;;  %v261_v53 = vld [vmem:[#allocation3 + $0x550] sm:$0xff]  ;;  %v1856_v57 = vpack.c.bf16 %v210_v49, %v207_v48  ;;  %v1634_v23 = vpack.c.bf16 %v215_v16, %v212_v15  ;;  %v220_v36 = vld [vmem:[#allocation3 + $0x408] sm:$0xff]  ;;  %v227_v40 = vld [vmem:[#allocation3 + $0x440] sm:$0xff] }
  0x7c   :  { %893 = vmatprep.mubr.f32.mxu1 %v83_v50  ;;  %v217_v31 = vld [vmem:[#allocation3 + $0x3f0] sm:$0xff]  ;;  %v224_v39 = vld [vmem:[#allocation3 + $0x428] sm:$0xff]  ;;  %v223_v43 = vld [vmem:[#allocation3 + $0x420] sm:$0xff] }
  0x7d   :  { %v333_v37 = vld [vmem:[#allocation3 + $0x790] sm:$0xff]  ;;  %v1640_v42 = vpack.c.bf16 %v220_v36, %v217_v31  ;;  %v226_v48 = vld [vmem:[#allocation3 + $0x438] sm:$0xff]  ;;  %v339_v49 = vld [vmem:[#allocation3 + $0x7c0] sm:$0xff] }
  0x7e   :  { %1605 = vmatpush1.bf16.msra.mxu0 %v1604_v60  ;;  %1849 = vmatpush3.bf16.msra.mxu1 %v1848_v32  ;;  %v1858_v60 = vpack.c.bf16 %v264_v54, %v261_v53  ;;  %v233_v52 = vld [vmem:[#allocation3 + $0x470] sm:$0xff]  ;;  %v1644_v56 = vpack.c.bf16 %v226_v48, %v223_v43  ;;  %v294_v59 = vld [vmem:[#allocation3 + $0x658] sm:$0xff]  ;;  %v232_v62 = vld [vmem:[#allocation3 + $0x468] sm:$0xff] }
  0x7f   :  { %1607 = vmatprep.subr.bf16.mxu0 %v1606_v1  ;;  %1851 = vmatprep.subr.bf16.mxu1 %v1850_v35  ;;  %v267_v1 = vld [vmem:[#allocation3 + $0x580] sm:$0xff]  ;;  %v229_v53 = vld [vmem:[#allocation3 + $0x450] sm:$0xff]  ;;  %v348_v0 = vld [vmem:[#allocation3 + $0x808] sm:$0xff] }
  0x80   :  { %v2218_v54 = vld [vmem:[%s2273_s0 + $0x10] sm:$0xff]  ;;  %v1648_v4 = vpack.c.bf16 %v232_v62, %v229_v53  ;;  %v238_v10 = vld [vmem:[#allocation3 + $0x498] sm:$0xff]  ;;  %v303_v19 = vld [vmem:[#allocation3 + $0x6a0] sm:$0xff] }
  0x81   :  { %v297_v7 = vld [vmem:[#allocation3 + $0x670] sm:$0xff]  ;;  %v354_v12 = vld [vmem:[#allocation3 + $0x838] sm:$0xff]  ;;  %v360_v24 = vld [vmem:[#allocation3 + $0x868] sm:$0xff] }
  0x82   :  { %1609 = vmatpush1.bf16.msra.mxu0 %v1608_v8  ;;  %1853 = vmatpush3.bf16.msra.mxu1 %v1852_v45  ;;  %v1862_v8 = vpack.c.bf16 %v270_v2, %v267_v1  ;;  %v285_v45 = vld [vmem:[#allocation3 + $0x610] sm:$0xff]  ;;  %v236_v1 = vld [vmem:[#allocation3 + $0x488] sm:$0xff]  ;;  %v239_v2 = vld [vmem:[#allocation3 + $0x4a0] sm:$0xff] }
  0x83   :  { %1611 = vmatprep.subr.bf16.mxu0 %v1610_v13  ;;  %1855 = vmatprep.subr.bf16.mxu1 %v1854_v47  ;;  %v273_v13 = vld [vmem:[#allocation3 + $0x5b0] sm:$0xff]  ;;  %v1642_v47 = vpack.c.bf16 %v227_v40, %v224_v39  ;;  %v1650_v9 = vpack.c.bf16 %v239_v2, %v236_v1  ;;  %v366_v36 = vld [vmem:[#allocation3 + $0x898] sm:$0xff]  ;;  %v315_v43 = vld [vmem:[#allocation3 + $0x700] sm:$0xff] }
  0x84   :  { %v1866_v20 = vpack.c.bf16 %v276_v14, %v273_v13  ;;  %v242_v13 = vld [vmem:[#allocation3 + $0x4b8] sm:$0xff]  ;;  %v245_v14 = vld [vmem:[#allocation3 + $0x4d0] sm:$0xff]  ;;  %v372_v48 = vld [vmem:[#allocation3 + $0x8c8] sm:$0xff] }
  0x85   :  { %v309_v31 = vld [vmem:[#allocation3 + $0x6d0] sm:$0xff]  ;;  %v259_v53 = vld [vmem:[#allocation3 + $0x540] sm:$0xff]  ;;  %v378_v62 = vld [vmem:[#allocation3 + $0x8f8] sm:$0xff] }
  0x86   :  { %1613 = vmatpush1.bf16.msra.mxu0 %v1612_v21  ;;  %1857 = vmatpush3.bf16.msra.mxu1 %v1856_v57  ;;  %v225_v21 = vld [vmem:[#allocation3 + $0x430] sm:$0xff] }
  0x87   :  { %1615 = vmatprep.subr.bf16.mxu0 %v1614_v26  ;;  %1859 = vmatprep.subr.bf16.mxu1 %v1858_v60  ;;  %v282_v26 = vld [vmem:[#allocation3 + $0x5f8] sm:$0xff]  ;;  %v1868_v29 = vpack.c.bf16 %v228_v22, %v225_v21  ;;  %v2223_v60 = vld [vmem:[%s2273_s0 + $0x28] sm:$0xff]  ;;  %v1654_v21 = vpack.c.bf16 %v245_v14, %v242_v13 }
  0x88   :  { %v1870_v32 = vpack.c.bf16 %v282_v26, %v279_v25  ;;  %v244_v22 = vld [vmem:[#allocation3 + $0x4c8] sm:$0xff]  ;;  %v251_v26 = vld [vmem:[#allocation3 + $0x500] sm:$0xff] }
  0x89   :  { %v248_v25 = vld [vmem:[#allocation3 + $0x4e8] sm:$0xff] }
  0x8a   :  { %1617 = vmatpush1.bf16.msra.mxu0 %v1616_v33  ;;  %1861 = vmatpush3.bf16.msra.mxu1 %v1860_v5  ;;  %v231_v33 = vld [vmem:[#allocation3 + $0x460] sm:$0xff] }
  0x8b   :  { %1619 = vmatprep.subr.bf16.mxu0 %v1618_v38  ;;  %1863 = vmatprep.subr.bf16.mxu1 %v1862_v8  ;;  %v336_v38 = vld [vmem:[#allocation3 + $0x7a8] sm:$0xff]  ;;  %v1872_v41 = vpack.c.bf16 %v234_v34, %v231_v33  ;;  %v235_v5 = vld [vmem:[#allocation3 + $0x480] sm:$0xff]  ;;  %v1658_v33 = vpack.c.bf16 %v251_v26, %v248_v25  ;;  %v250_v34 = vld [vmem:[#allocation3 + $0x4f8] sm:$0xff] }
  0x8c   :  { %v1874_v44 = vpack.c.bf16 %v336_v38, %v333_v37  ;;  %v300_v8 = vld [vmem:[#allocation3 + $0x688] sm:$0xff]  ;;  %v1652_v16 = vpack.c.bf16 %v238_v10, %v235_v5  ;;  %v254_v37 = vld [vmem:[#allocation3 + $0x518] sm:$0xff]  ;;  %v257_v38 = vld [vmem:[#allocation3 + $0x530] sm:$0xff] }
  0x8d   :  { %540 = vmatmul.mubr.f32.vlgmr.msra.gmra.mrb[0].mxu0 %v80_v27  ;;  %v218_v27 = vld [vmem:[#allocation3 + $0x3f8] sm:$0xff]  ;;  %v1884_v15 = vpack.c.bf16 %v300_v8, %v297_v7  ;;  %v327_v5 = vld [vmem:[#allocation3 + $0x760] sm:$0xff]  ;;  %v268_v8 = vld [vmem:[#allocation3 + $0x588] sm:$0xff] }
  0x8e   :  { %1621 = vmatpush1.bf16.msra.mxu0 %v1620_v46  ;;  %610 = vmatprep.mubr.f32.mxu0 %v83_v50  ;;  %v1638_v35 = vpack.c.bf16 %v221_v28, %v218_v27  ;;  %v288_v46 = vld [vmem:[#allocation3 + $0x628] sm:$0xff]  ;;  %v342_v50 = vld [vmem:[#allocation3 + $0x7d8] sm:$0xff]  ;;  %v277_v25 = vld [vmem:[#allocation3 + $0x5d0] sm:$0xff] }
  0x8f   :  { %1623 = vmatprep.subr.bf16.mxu0 %v1622_v51  ;;  %1865 = vmatpush3.bf16.msra.mxu1 %v1864_v17  ;;  %v230_v51 = vld [vmem:[#allocation3 + $0x458] sm:$0xff]  ;;  %v1876_v55 = vpack.c.bf16 %v288_v46, %v285_v45  ;;  %v1878_v57 = vpack.c.bf16 %v342_v50, %v339_v49  ;;  %v241_v17 = vld [vmem:[#allocation3 + $0x4b0] sm:$0xff]  ;;  %v1662_v45 = vpack.c.bf16 %v257_v38, %v254_v37  ;;  %v256_v46 = vld [vmem:[#allocation3 + $0x528] sm:$0xff] }
  0x90   :  { %1867 = vmatprep.subr.bf16.mxu1 %v1866_v20  ;;  %v1646_v61 = vpack.c.bf16 %v233_v52, %v230_v51  ;;  %v306_v20 = vld [vmem:[#allocation3 + $0x6b8] sm:$0xff]  ;;  %v1656_v28 = vpack.c.bf16 %v244_v22, %v241_v17  ;;  %v260_v49 = vld [vmem:[#allocation3 + $0x548] sm:$0xff]  ;;  %v263_v50 = vld [vmem:[#allocation3 + $0x560] sm:$0xff] }
  0x91   :  { %v1888_v27 = vpack.c.bf16 %v306_v20, %v303_v19  ;;  %v432_v10 = vld [vmem:[#allocation3 + $0xaa8] sm:$0xff]  ;;  %v381_v17 = vld [vmem:[#allocation3 + $0x910] sm:$0xff]  ;;  %v274_v20 = vld [vmem:[#allocation3 + $0x5b8] sm:$0xff] }
  0x92   :  { %1625 = vmatpush1.bf16.msra.mxu0 %v1624_v58  ;;  %v291_v58 = vld [vmem:[#allocation3 + $0x640] sm:$0xff]  ;;  %v438_v22 = vld [vmem:[#allocation3 + $0xad8] sm:$0xff]  ;;  %v284_v37 = vld [vmem:[#allocation3 + $0x608] sm:$0xff] }
  0x93   :  { %1627 = vmatprep.subr.bf16.mxu0 %v1626_v63  ;;  %1869 = vmatpush3.bf16.msra.mxu1 %v1868_v29  ;;  %v345_v63 = vld [vmem:[#allocation3 + $0x7f0] sm:$0xff]  ;;  %v1880_v3 = vpack.c.bf16 %v294_v59, %v291_v58  ;;  %v247_v29 = vld [vmem:[#allocation3 + $0x4e0] sm:$0xff]  ;;  %v1666_v58 = vpack.c.bf16 %v263_v50, %v260_v49  ;;  %v262_v59 = vld [vmem:[#allocation3 + $0x558] sm:$0xff] }
  0x94   :  { %1871 = vmatprep.subr.bf16.mxu1 %v1870_v32  ;;  %v312_v32 = vld [vmem:[#allocation3 + $0x6e8] sm:$0xff]  ;;  %v1660_v40 = vpack.c.bf16 %v250_v34, %v247_v29  ;;  %v1668_v2 = vpack.c.bf16 %v262_v59, %v259_v53  ;;  %v2230_v26 = vld [vmem:[%s2273_s0 + $0x20] sm:$0xff]  ;;  %v290_v49 = vld [vmem:[#allocation3 + $0x638] sm:$0xff] }
  0x95   :  { %v1892_v39 = vpack.c.bf16 %v312_v32, %v309_v31  ;;  %v390_v31 = vld [vmem:[#allocation3 + $0x958] sm:$0xff]  ;;  %v280_v34 = vld [vmem:[#allocation3 + $0x5e8] sm:$0xff]  ;;  %v287_v38 = vld [vmem:[#allocation3 + $0x620] sm:$0xff] }
  0x96   :  { %1629 = vmatpush1.bf16.msra.mxu0 %v1628_v6  ;;  %v1882_v6 = vpack.c.bf16 %v348_v0, %v345_v63  ;;  %v266_v63 = vld [vmem:[#allocation3 + $0x578] sm:$0xff]  ;;  %v269_v0 = vld [vmem:[#allocation3 + $0x590] sm:$0xff]  ;;  %v292_v59 = vld [vmem:[#allocation3 + $0x648] sm:$0xff] }
  0x97   :  { %1631 = vmatprep.subr.bf16.mxu0 %v1630_v11  ;;  %1873 = vmatpush3.bf16.msra.mxu1 %v1872_v41  ;;  %v351_v11 = vld [vmem:[#allocation3 + $0x820] sm:$0xff]  ;;  %v253_v41 = vld [vmem:[#allocation3 + $0x510] sm:$0xff]  ;;  %v1670_v7 = vpack.c.bf16 %v269_v0, %v266_v63  ;;  %v2235_v32 = vld [vmem:[%s2273_s0 + $0x38] sm:$0xff] }
  0x98   :  { %1875 = vmatprep.subr.bf16.mxu1 %v1874_v44  ;;  %v318_v44 = vld [vmem:[#allocation3 + $0x718] sm:$0xff]  ;;  %v1664_v52 = vpack.c.bf16 %v256_v46, %v253_v41  ;;  %v283_v41 = vld [vmem:[#allocation3 + $0x600] sm:$0xff]  ;;  %v293_v50 = vld [vmem:[#allocation3 + $0x650] sm:$0xff] }
  0x99   :  { %v1896_v51 = vpack.c.bf16 %v318_v44, %v315_v43  ;;  %v393_v43 = vld [vmem:[#allocation3 + $0x970] sm:$0xff]  ;;  %v396_v44 = vld [vmem:[#allocation3 + $0x988] sm:$0xff]  ;;  %v286_v46 = vld [vmem:[#allocation3 + $0x618] sm:$0xff] }
  0x9a   :  { %1633 = vmatpush1.bf16.msra.mxu0 %v1632_v18  ;;  %894 = vmatmul.mubr.f32.vlgmr.msra.gmra.mrb[2].mxu1 %v2218_v54  ;;  %v1886_v18 = vpack.c.bf16 %v354_v12, %v351_v11  ;;  %v272_v11 = vld [vmem:[#allocation3 + $0x5a8] sm:$0xff]  ;;  %v275_v12 = vld [vmem:[#allocation3 + $0x5c0] sm:$0xff]  ;;  %v289_v53 = vld [vmem:[#allocation3 + $0x630] sm:$0xff] }
  0x9b   :  { %1635 = vmatprep.subr.bf16.mxu0 %v1634_v23  ;;  %1877 = vmatpush3.bf16.msra.mxu1 %v1876_v55  ;;  %v357_v23 = vld [vmem:[#allocation3 + $0x850] sm:$0xff]  ;;  %v1674_v19 = vpack.c.bf16 %v275_v12, %v272_v11  ;;  %v296_v63 = vld [vmem:[#allocation3 + $0x668] sm:$0xff]  ;;  %v299_v0 = vld [vmem:[#allocation3 + $0x680] sm:$0xff] }
  0x9c   :  { %963 = vmatprep.mubr.f32.mxu1 %v2223_v60  ;;  %1879 = vmatprep.subr.bf16.mxu1 %v1878_v57  ;;  %v324_v57 = vld [vmem:[#allocation3 + $0x748] sm:$0xff]  ;;  %v302_v11 = vld [vmem:[#allocation3 + $0x698] sm:$0xff]  ;;  %v305_v12 = vld [vmem:[#allocation3 + $0x6b0] sm:$0xff] }
  0x9e   :  { %1637 = vmatpush1.bf16.msra.mxu0 %v1636_v30  ;;  %v1890_v30 = vpack.c.bf16 %v360_v24, %v357_v23  ;;  %v278_v23 = vld [vmem:[#allocation3 + $0x5d8] sm:$0xff]  ;;  %v281_v24 = vld [vmem:[#allocation3 + $0x5f0] sm:$0xff] }
  0x9f   :  { %1639 = vmatprep.subr.bf16.mxu0 %v1638_v35  ;;  %1881 = vmatpush3.bf16.msra.mxu1 %v1880_v3  ;;  %v363_v35 = vld [vmem:[#allocation3 + $0x880] sm:$0xff]  ;;  %v265_v3 = vld [vmem:[#allocation3 + $0x570] sm:$0xff] }
  0xa0   :  { %1883 = vmatprep.subr.bf16.mxu1 %v1882_v6  ;;  %v330_v6 = vld [vmem:[#allocation3 + $0x778] sm:$0xff]  ;;  %v1672_v14 = vpack.c.bf16 %v268_v8, %v265_v3  ;;  %v295_v3 = vld [vmem:[#allocation3 + $0x660] sm:$0xff] }
  0xa1   :  { %v1904_v13 = vpack.c.bf16 %v330_v6, %v327_v5  ;;  %v405_v5 = vld [vmem:[#allocation3 + $0x9d0] sm:$0xff]  ;;  %v408_v6 = vld [vmem:[#allocation3 + $0x9e8] sm:$0xff]  ;;  %v298_v8 = vld [vmem:[#allocation3 + $0x678] sm:$0xff] }
  0xa2   :  { %1641 = vmatpush1.bf16.msra.mxu0 %v1640_v42  ;;  %v1894_v42 = vpack.c.bf16 %v366_v36, %v363_v35  ;;  %v441_v35 = vld [vmem:[#allocation3 + $0xaf0] sm:$0xff]  ;;  %v444_v36 = vld [vmem:[#allocation3 + $0xb08] sm:$0xff] }
  0xa3   :  { %1643 = vmatprep.subr.bf16.mxu0 %v1642_v47  ;;  %1885 = vmatpush3.bf16.msra.mxu1 %v1884_v15  ;;  %v369_v47 = vld [vmem:[#allocation3 + $0x8b0] sm:$0xff]  ;;  %v271_v15 = vld [vmem:[#allocation3 + $0x5a0] sm:$0xff] }
  0xa4   :  { %1887 = vmatprep.subr.bf16.mxu1 %v1886_v18  ;;  %v1898_v55 = vpack.c.bf16 %v372_v48, %v369_v47  ;;  %v384_v18 = vld [vmem:[#allocation3 + $0x928] sm:$0xff]  ;;  %v447_v47 = vld [vmem:[#allocation3 + $0xb20] sm:$0xff]  ;;  %v450_v48 = vld [vmem:[#allocation3 + $0xb38] sm:$0xff] }
  0xa6   :  { %1645 = vmatpush1.bf16.msra.mxu0 %v1644_v56  ;;  %v321_v56 = vld [vmem:[#allocation3 + $0x730] sm:$0xff] }
  0xa7   :  { %1647 = vmatprep.subr.bf16.mxu0 %v1646_v61  ;;  %1889 = vmatpush3.bf16.msra.mxu1 %v1888_v27  ;;  %v375_v61 = vld [vmem:[#allocation3 + $0x8e0] sm:$0xff]  ;;  %v1900_v1 = vpack.c.bf16 %v324_v57, %v321_v56  ;;  %v1908_v27 = vpack.c.bf16 %v384_v18, %v381_v17  ;;  %v402_v57 = vld [vmem:[#allocation3 + $0x9b8] sm:$0xff]  ;;  %v1694_v18 = vpack.c.bf16 %v305_v12, %v302_v11 }
  0xa8   :  { %1891 = vmatprep.subr.bf16.mxu1 %v1890_v30  ;;  %v387_v30 = vld [vmem:[#allocation3 + $0x940] sm:$0xff]  ;;  %v414_v17 = vld [vmem:[#allocation3 + $0xa18] sm:$0xff] }
  0xa9   :  { %v399_v56 = vld [vmem:[#allocation3 + $0x9a0] sm:$0xff] }
  0xaa   :  { %1649 = vmatpush1.bf16.msra.mxu0 %v1648_v4  ;;  %v1902_v4 = vpack.c.bf16 %v378_v62, %v375_v61  ;;  %v453_v61 = vld [vmem:[#allocation3 + $0xb50] sm:$0xff]  ;;  %v456_v62 = vld [vmem:[#allocation3 + $0xb68] sm:$0xff] }
  0xab   :  { %1651 = vmatprep.subr.bf16.mxu0 %v1650_v9  ;;  %1893 = vmatpush3.bf16.msra.mxu1 %v1892_v39  ;;  %v429_v9 = vld [vmem:[#allocation3 + $0xa90] sm:$0xff]  ;;  %v1912_v39 = vpack.c.bf16 %v390_v31, %v387_v30  ;;  %v310_v31 = vld [vmem:[#allocation3 + $0x6d8] sm:$0xff] }
  0xac   :  { %1895 = vmatprep.subr.bf16.mxu1 %v1894_v42  ;;  %v1914_v42 = vpack.c.bf16 %v444_v36, %v441_v35  ;;  %v314_v35 = vld [vmem:[#allocation3 + $0x6f8] sm:$0xff]  ;;  %v317_v36 = vld [vmem:[#allocation3 + $0x710] sm:$0xff] }
  0xae   :  { %1653 = vmatpush1.bf16.msra.mxu0 %v1652_v16  ;;  %v1906_v16 = vpack.c.bf16 %v432_v10, %v429_v9  ;;  %v459_v9 = vld [vmem:[#allocation3 + $0xb80] sm:$0xff]  ;;  %v462_v10 = vld [vmem:[#allocation3 + $0xb98] sm:$0xff] }
  0xaf   :  { %1655 = vmatprep.subr.bf16.mxu0 %v1654_v21  ;;  %1897 = vmatpush3.bf16.msra.mxu1 %v1896_v51  ;;  %v435_v21 = vld [vmem:[#allocation3 + $0xac0] sm:$0xff]  ;;  %v1916_v51 = vpack.c.bf16 %v396_v44, %v393_v43  ;;  %v313_v43 = vld [vmem:[#allocation3 + $0x6f0] sm:$0xff]  ;;  %v316_v44 = vld [vmem:[#allocation3 + $0x708] sm:$0xff] }
  0xb0   :  { %1899 = vmatprep.subr.bf16.mxu1 %v1898_v55  ;;  %v1910_v29 = vpack.c.bf16 %v438_v22, %v435_v21  ;;  %v1918_v55 = vpack.c.bf16 %v450_v48, %v447_v47  ;;  %v468_v21 = vld [vmem:[#allocation3 + $0xbc8] sm:$0xff]  ;;  %v1704_v48 = vpack.c.bf16 %v316_v44, %v313_v43  ;;  %v373_v43 = vld [vmem:[#allocation3 + $0x8d0] sm:$0xff] }
  0xb1   :  { %v308_v22 = vld [vmem:[#allocation3 + $0x6c8] sm:$0xff] }
  0xb2   :  { %1657 = vmatpush1.bf16.msra.mxu0 %v1656_v28  ;;  %v1676_v28 = vpack.c.bf16 %v274_v20, %v271_v15  ;;  %v1926_v15 = vpack.c.bf16 %v462_v10, %v459_v9  ;;  %v465_v20 = vld [vmem:[#allocation3 + $0xbb0] sm:$0xff]  ;;  %v344_v9 = vld [vmem:[#allocation3 + $0x7e8] sm:$0xff]  ;;  %v347_v10 = vld [vmem:[#allocation3 + $0x800] sm:$0xff] }
  0xb3   :  { %1659 = vmatprep.subr.bf16.mxu0 %v1658_v33  ;;  %1901 = vmatpush3.bf16.msra.mxu1 %v1900_v1  ;;  %v1678_v33 = vpack.c.bf16 %v281_v24, %v278_v23  ;;  %v1920_v1 = vpack.c.bf16 %v402_v57, %v399_v56  ;;  %v311_v23 = vld [vmem:[#allocation3 + $0x6e0] sm:$0xff]  ;;  %v1722_v12 = vpack.c.bf16 %v347_v10, %v344_v9  ;;  %v376_v44 = vld [vmem:[#allocation3 + $0x8e8] sm:$0xff] }
  0xb4   :  { %1903 = vmatprep.subr.bf16.mxu1 %v1902_v4  ;;  %v1922_v4 = vpack.c.bf16 %v456_v62, %v453_v61  ;;  %v1698_v30 = vpack.c.bf16 %v311_v23, %v308_v22  ;;  %v332_v61 = vld [vmem:[#allocation3 + $0x788] sm:$0xff]  ;;  %v335_v62 = vld [vmem:[#allocation3 + $0x7a0] sm:$0xff] }
  0xb5   :  { %v407_v9 = vld [vmem:[#allocation3 + $0x9e0] sm:$0xff] }
  0xb6   :  { %1661 = vmatpush1.bf16.msra.mxu0 %v1660_v40  ;;  %v1680_v40 = vpack.c.bf16 %v280_v34, %v277_v25  ;;  %v307_v25 = vld [vmem:[#allocation3 + $0x6c0] sm:$0xff]  ;;  %v474_v34 = vld [vmem:[#allocation3 + $0xbf8] sm:$0xff] }
  0xb7   :  { %1663 = vmatprep.subr.bf16.mxu0 %v1662_v45  ;;  %1905 = vmatpush3.bf16.msra.mxu1 %v1904_v13  ;;  %v1682_v45 = vpack.c.bf16 %v287_v38, %v284_v37  ;;  %v1692_v13 = vpack.c.bf16 %v298_v8, %v295_v3  ;;  %v1700_v38 = vpack.c.bf16 %v310_v31, %v307_v25  ;;  %v338_v3 = vld [vmem:[#allocation3 + $0x7b8] sm:$0xff]  ;;  %v340_v8 = vld [vmem:[#allocation3 + $0x7c8] sm:$0xff] }
  0xb8   :  { %1907 = vmatprep.subr.bf16.mxu1 %v1906_v16  ;;  %v411_v16 = vld [vmem:[#allocation3 + $0xa00] sm:$0xff]  ;;  %v362_v25 = vld [vmem:[#allocation3 + $0x878] sm:$0xff]  ;;  %v364_v31 = vld [vmem:[#allocation3 + $0x888] sm:$0xff] }
  0xba   :  { %1665 = vmatpush1.bf16.msra.mxu0 %v1664_v52  ;;  %964 = vmatmul.mubr.f32.vlgmr.msra.gmra.mrb[4].mxu1 %v2230_v26  ;;  %v1684_v52 = vpack.c.bf16 %v286_v46, %v283_v41  ;;  %v426_v41 = vld [vmem:[#allocation3 + $0xa78] sm:$0xff]  ;;  %v323_v46 = vld [vmem:[#allocation3 + $0x740] sm:$0xff] }
  0xbb   :  { %1667 = vmatprep.subr.bf16.mxu0 %v1666_v58  ;;  %1909 = vmatpush3.bf16.msra.mxu1 %v1908_v27  ;;  %v1686_v58 = vpack.c.bf16 %v293_v50, %v290_v49  ;;  %v1930_v27 = vpack.c.bf16 %v468_v21, %v465_v20  ;;  %v319_v50 = vld [vmem:[#allocation3 + $0x720] sm:$0xff]  ;;  %v356_v20 = vld [vmem:[#allocation3 + $0x848] sm:$0xff] }
  0xbc   :  { %1033 = vmatprep.mubr.f32.mxu1 %v2235_v32  ;;  %1911 = vmatprep.subr.bf16.mxu1 %v1910_v29  ;;  %v420_v29 = vld [vmem:[#allocation3 + $0xa48] sm:$0xff]  ;;  %v359_v21 = vld [vmem:[#allocation3 + $0x860] sm:$0xff] }
  0xbd   :  { %v1730_v23 = vpack.c.bf16 %v359_v21, %v356_v20  ;;  %v415_v21 = vld [vmem:[#allocation3 + $0xa20] sm:$0xff] }
  0xbe   :  { %1669 = vmatpush1.bf16.msra.mxu0 %v1668_v2  ;;  %v1688_v2 = vpack.c.bf16 %v292_v59, %v289_v53  ;;  %v329_v53 = vld [vmem:[#allocation3 + $0x770] sm:$0xff]  ;;  %v328_v59 = vld [vmem:[#allocation3 + $0x768] sm:$0xff] }
  0xbf   :  { %1671 = vmatprep.subr.bf16.mxu0 %v1670_v7  ;;  %1913 = vmatpush3.bf16.msra.mxu1 %v1912_v39  ;;  %v1690_v7 = vpack.c.bf16 %v299_v0, %v296_v63  ;;  %v1714_v0 = vpack.c.bf16 %v335_v62, %v332_v61  ;;  %v395_v61 = vld [vmem:[#allocation3 + $0x980] sm:$0xff] }
  0xc0   :  { %1915 = vmatprep.subr.bf16.mxu1 %v1914_v42  ;;  %v1702_v42 = vpack.c.bf16 %v317_v36, %v314_v35 }
  0xc2   :  { %1673 = vmatpush1.bf16.msra.mxu0 %v1672_v14  ;;  %v301_v14 = vld [vmem:[#allocation3 + $0x690] sm:$0xff] }
  0xc3   :  { %1675 = vmatprep.subr.bf16.mxu0 %v1674_v19  ;;  %1917 = vmatpush3.bf16.msra.mxu1 %v1916_v51  ;;  %v304_v19 = vld [vmem:[#allocation3 + $0x6a8] sm:$0xff]  ;;  %v322_v51 = vld [vmem:[#allocation3 + $0x738] sm:$0xff] }
  0xc4   :  { %1919 = vmatprep.subr.bf16.mxu1 %v1918_v55  ;;  %v1696_v24 = vpack.c.bf16 %v304_v19, %v301_v14  ;;  %v2244_v55 = vld [vmem:[%s2273_s0 + $0x30] sm:$0xff]  ;;  %v1708_v56 = vpack.c.bf16 %v322_v51, %v319_v50  ;;  %v350_v14 = vld [vmem:[#allocation3 + $0x818] sm:$0xff]  ;;  %v352_v19 = vld [vmem:[#allocation3 + $0x828] sm:$0xff] }
  0xc5   :  { %v382_v50 = vld [vmem:[#allocation3 + $0x918] sm:$0xff] }
  0xc6   :  { %1677 = vmatpush1.bf16.msra.mxu0 %v1676_v28  ;;  %v417_v28 = vld [vmem:[#allocation3 + $0xa30] sm:$0xff]  ;;  %v386_v51 = vld [vmem:[#allocation3 + $0x938] sm:$0xff] }
  0xc7   :  { %1679 = vmatprep.subr.bf16.mxu0 %v1678_v33  ;;  %1921 = vmatpush3.bf16.msra.mxu1 %v1920_v1  ;;  %v471_v33 = vld [vmem:[#allocation3 + $0xbe0] sm:$0xff]  ;;  %v1932_v37 = vpack.c.bf16 %v420_v29, %v417_v28 }
  0xc8   :  { %1923 = vmatprep.subr.bf16.mxu1 %v1922_v4  ;;  %v1934_v39 = vpack.c.bf16 %v474_v34, %v471_v33  ;;  %v331_v1 = vld [vmem:[#allocation3 + $0x780] sm:$0xff]  ;;  %v341_v4 = vld [vmem:[#allocation3 + $0x7d0] sm:$0xff]  ;;  %v368_v33 = vld [vmem:[#allocation3 + $0x8a8] sm:$0xff] }
  0xc9   :  { %v371_v34 = vld [vmem:[#allocation3 + $0x8c0] sm:$0xff] }
  0xca   :  { %1681 = vmatpush1.bf16.msra.mxu0 %v1680_v40  ;;  %v423_v40 = vld [vmem:[#allocation3 + $0xa60] sm:$0xff]  ;;  %v1738_v36 = vpack.c.bf16 %v371_v34, %v368_v33 }
  0xcb   :  { %1683 = vmatprep.subr.bf16.mxu0 %v1682_v45  ;;  %v320_v45 = vld [vmem:[#allocation3 + $0x728] sm:$0xff]  ;;  %v1936_v47 = vpack.c.bf16 %v426_v41, %v423_v40  ;;  %v377_v40 = vld [vmem:[#allocation3 + $0x8f0] sm:$0xff]  ;;  %v427_v34 = vld [vmem:[#allocation3 + $0xa80] sm:$0xff] }
  0xcc   :  { %v1706_v49 = vpack.c.bf16 %v323_v46, %v320_v45  ;;  %v380_v45 = vld [vmem:[#allocation3 + $0x908] sm:$0xff]  ;;  %v383_v46 = vld [vmem:[#allocation3 + $0x920] sm:$0xff] }
  0xcd   :  { %611 = vmatmul.mubr.f32.vlgmr.msra.gmra.mrb[0].mxu0 %v2218_v54  ;;  %v1924_v54 = vpack.c.bf16 %v408_v6, %v405_v5  ;;  %v1718_v6 = vpack.c.bf16 %v341_v4, %v338_v3  ;;  %v401_v3 = vld [vmem:[#allocation3 + $0x9b0] sm:$0xff] }
  0xce   :  { %1685 = vmatpush1.bf16.msra.mxu0 %v1684_v52  ;;  %681 = vmatprep.mubr.f32.mxu0 %v2223_v60  ;;  %v1928_v60 = vpack.c.bf16 %v414_v17, %v411_v16  ;;  %v326_v52 = vld [vmem:[#allocation3 + $0x758] sm:$0xff] }
  0xcf   :  { %1687 = vmatprep.subr.bf16.mxu0 %v1686_v58  ;;  %1925 = vmatpush3.bf16.msra.mxu1 %v1924_v54  ;;  %v1710_v57 = vpack.c.bf16 %v329_v53, %v326_v52  ;;  %v325_v58 = vld [vmem:[#allocation3 + $0x750] sm:$0xff]  ;;  %v343_v54 = vld [vmem:[#allocation3 + $0x7e0] sm:$0xff] }
  0xd0   :  { %1927 = vmatprep.subr.bf16.mxu1 %v1926_v15  ;;  %v1712_v63 = vpack.c.bf16 %v328_v59, %v325_v58  ;;  %v353_v15 = vld [vmem:[#allocation3 + $0x830] sm:$0xff]  ;;  %v388_v58 = vld [vmem:[#allocation3 + $0x948] sm:$0xff] }
  0xd1   :  { %v1726_v17 = vpack.c.bf16 %v353_v15, %v350_v14  ;;  %v389_v52 = vld [vmem:[#allocation3 + $0x950] sm:$0xff]  ;;  %v392_v59 = vld [vmem:[#allocation3 + $0x968] sm:$0xff] }
  0xd2   :  { %1689 = vmatpush1.bf16.msra.mxu0 %v1688_v2  ;;  %v334_v2 = vld [vmem:[#allocation3 + $0x798] sm:$0xff]  ;;  %v409_v15 = vld [vmem:[#allocation3 + $0x9f0] sm:$0xff] }
  0xd3   :  { %1691 = vmatprep.subr.bf16.mxu0 %v1690_v7  ;;  %1929 = vmatpush3.bf16.msra.mxu1 %v1928_v60  ;;  %v1716_v5 = vpack.c.bf16 %v334_v2, %v331_v1  ;;  %v337_v7 = vld [vmem:[#allocation3 + $0x7b0] sm:$0xff]  ;;  %v355_v60 = vld [vmem:[#allocation3 + $0x840] sm:$0xff]  ;;  %v394_v1 = vld [vmem:[#allocation3 + $0x978] sm:$0xff] }
  0xd4   :  { %1931 = vmatprep.subr.bf16.mxu1 %v1930_v27  ;;  %v1720_v11 = vpack.c.bf16 %v340_v8, %v337_v7  ;;  %v365_v27 = vld [vmem:[#allocation3 + $0x890] sm:$0xff]  ;;  %v398_v2 = vld [vmem:[#allocation3 + $0x998] sm:$0xff]  ;;  %v400_v7 = vld [vmem:[#allocation3 + $0x9a8] sm:$0xff] }
  0xd5   :  { %v1734_v29 = vpack.c.bf16 %v365_v27, %v362_v25  ;;  %v404_v8 = vld [vmem:[#allocation3 + $0x9c8] sm:$0xff]  ;;  %v421_v27 = vld [vmem:[#allocation3 + $0xa50] sm:$0xff] }
  0xd6   :  { %1693 = vmatpush1.bf16.msra.mxu0 %v1692_v13  ;;  %v346_v13 = vld [vmem:[#allocation3 + $0x7f8] sm:$0xff]  ;;  %v1762_v10 = vpack.c.bf16 %v407_v9, %v404_v8  ;;  %v463_v9 = vld [vmem:[#allocation3 + $0xba0] sm:$0xff] }
  0xd7   :  { %1695 = vmatprep.subr.bf16.mxu0 %v1694_v18  ;;  %1933 = vmatpush3.bf16.msra.mxu1 %v1932_v37  ;;  %v1724_v16 = vpack.c.bf16 %v346_v13, %v343_v54  ;;  %v349_v18 = vld [vmem:[#allocation3 + $0x810] sm:$0xff]  ;;  %v367_v37 = vld [vmem:[#allocation3 + $0x8a0] sm:$0xff] }
  0xd8   :  { %1935 = vmatprep.subr.bf16.mxu1 %v1934_v39  ;;  %v1728_v22 = vpack.c.bf16 %v352_v19, %v349_v18  ;;  %v374_v39 = vld [vmem:[#allocation3 + $0x8d8] sm:$0xff]  ;;  %v413_v54 = vld [vmem:[#allocation3 + $0xa10] sm:$0xff]  ;;  %v419_v18 = vld [vmem:[#allocation3 + $0xa40] sm:$0xff] }
  0xda   :  { %1697 = vmatpush1.bf16.msra.mxu0 %v1696_v24  ;;  %v358_v24 = vld [vmem:[#allocation3 + $0x858] sm:$0xff] }
  0xdb   :  { %1699 = vmatprep.subr.bf16.mxu0 %v1698_v30  ;;  %1937 = vmatpush3.bf16.msra.mxu1 %v1936_v47  ;;  %v1732_v28 = vpack.c.bf16 %v358_v24, %v355_v60  ;;  %v361_v30 = vld [vmem:[#allocation3 + $0x870] sm:$0xff]  ;;  %v1744_v47 = vpack.c.bf16 %v376_v44, %v373_v43  ;;  %v443_v43 = vld [vmem:[#allocation3 + $0xb00] sm:$0xff] }
  0xdc   :  { %v1736_v35 = vpack.c.bf16 %v364_v31, %v361_v30  ;;  %v425_v60 = vld [vmem:[#allocation3 + $0xa70] sm:$0xff]  ;;  %v431_v30 = vld [vmem:[#allocation3 + $0xaa0] sm:$0xff] }
  0xde   :  { %1701 = vmatpush1.bf16.msra.mxu0 %v1700_v38  ;;  %1034 = vmatmul.mubr.f32.vlgmr.msra.gmra.mrb[6].mxu1 %v2244_v55  ;;  %v370_v38 = vld [vmem:[#allocation3 + $0x8b8] sm:$0xff] }
  0xdf   :  { %1703 = vmatprep.subr.bf16.mxu0 %v1702_v42  ;;  %v1740_v41 = vpack.c.bf16 %v370_v38, %v367_v37  ;;  %v1742_v42 = vpack.c.bf16 %v377_v40, %v374_v39  ;;  %v437_v37 = vld [vmem:[#allocation3 + $0xad0] sm:$0xff] }
  0xe0   :  { %v433_v40 = vld [vmem:[#allocation3 + $0xab0] sm:$0xff] }
  0xe2   :  { %1705 = vmatpush1.bf16.msra.mxu0 %v1704_v48  ;;  %v1746_v48 = vpack.c.bf16 %v383_v46, %v380_v45  ;;  %v439_v46 = vld [vmem:[#allocation3 + $0xae0] sm:$0xff] }
  0xe3   :  { %1707 = vmatprep.subr.bf16.mxu0 %v1706_v49  ;;  %v379_v49 = vld [vmem:[#allocation3 + $0x900] sm:$0xff] }
  0xe4   :  { %v1748_v53 = vpack.c.bf16 %v382_v50, %v379_v49  ;;  %v449_v49 = vld [vmem:[#allocation3 + $0xb30] sm:$0xff] }
  0xe6   :  { %1709 = vmatpush1.bf16.msra.mxu0 %v1708_v56  ;;  %v1750_v56 = vpack.c.bf16 %v389_v52, %v386_v51  ;;  %v445_v52 = vld [vmem:[#allocation3 + $0xb10] sm:$0xff] }
  0xe7   :  { %1711 = vmatprep.subr.bf16.mxu0 %v1710_v57  ;;  %v385_v57 = vld [vmem:[#allocation3 + $0x930] sm:$0xff] }
  0xe8   :  { %v1752_v62 = vpack.c.bf16 %v388_v58, %v385_v57  ;;  %v455_v57 = vld [vmem:[#allocation3 + $0xb60] sm:$0xff] }
  0xea   :  { %1713 = vmatpush1.bf16.msra.mxu0 %v1712_v63  ;;  %v1754_v63 = vpack.c.bf16 %v395_v61, %v392_v59  ;;  %v451_v61 = vld [vmem:[#allocation3 + $0xb40] sm:$0xff] }
  0xeb   :  { %1715 = vmatprep.subr.bf16.mxu0 %v1714_v0  ;;  %v391_v0 = vld [vmem:[#allocation3 + $0x960] sm:$0xff] }
  0xec   :  { %v1756_v4 = vpack.c.bf16 %v394_v1, %v391_v0  ;;  %v461_v0 = vld [vmem:[#allocation3 + $0xb90] sm:$0xff] }
  0xee   :  { %1717 = vmatpush1.bf16.msra.mxu0 %v1716_v5  ;;  %v1758_v5 = vpack.c.bf16 %v401_v3, %v398_v2  ;;  %v457_v3 = vld [vmem:[#allocation3 + $0xb70] sm:$0xff] }
  0xef   :  { %1719 = vmatprep.subr.bf16.mxu0 %v1718_v6  ;;  %v397_v6 = vld [vmem:[#allocation3 + $0x990] sm:$0xff] }
  0xf2   :  { %1721 = vmatpush1.bf16.msra.mxu0 %v1720_v11  ;;  %v403_v11 = vld [vmem:[#allocation3 + $0x9c0] sm:$0xff] }
  0xf3   :  { %1723 = vmatprep.subr.bf16.mxu0 %v1722_v12  ;;  %v410_v12 = vld [vmem:[#allocation3 + $0x9f8] sm:$0xff] }
  0xf4   :  { %v1766_v14 = vpack.c.bf16 %v413_v54, %v410_v12  ;;  %v472_v12 = vld [vmem:[#allocation3 + $0xbe8] sm:$0xff] }
  0xf5   :  { %v1135_v54 = vld [vmem:[#allocation7 + $0x80] sm:$0xff] }
  0xf6   :  { %1725 = vmatpush1.bf16.msra.mxu0 %v1724_v16  ;;  %v412_v16 = vld [vmem:[#allocation3 + $0xa08] sm:$0xff] }
  0xf7   :  { %1727 = vmatprep.subr.bf16.mxu0 %v1726_v17  ;;  %v416_v17 = vld [vmem:[#allocation3 + $0xa28] sm:$0xff]  ;;  %v1768_v19 = vpack.c.bf16 %v412_v16, %v409_v15 }
  0xf8   :  { %v1770_v20 = vpack.c.bf16 %v419_v18, %v416_v17  ;;  %v1120_v17 = vld [vmem:[#allocation7 + $0x8] sm:$0xff]  ;;  %v1137_v18 = vld [vmem:[#allocation7 + $0x90] sm:$0xff] }
  0xfa   :  { %1729 = vmatpush1.bf16.msra.mxu0 %v1728_v22  ;;  %v418_v22 = vld [vmem:[#allocation3 + $0xa38] sm:$0xff] }
  0xfb   :  { %1731 = vmatprep.subr.bf16.mxu0 %v1730_v23  ;;  %v422_v23 = vld [vmem:[#allocation3 + $0xa58] sm:$0xff]  ;;  %v1772_v24 = vpack.c.bf16 %v418_v22, %v415_v21 }
  0xfc   :  { %v1774_v25 = vpack.c.bf16 %v425_v60, %v422_v23  ;;  %v1121_v23 = vld [vmem:[#allocation7 + $0x10] sm:$0xff]  ;;  %v1122_v60 = vld [vmem:[#allocation7 + $0x18] sm:$0xff] }
  0xfe   :  { %1733 = vmatpush1.bf16.msra.mxu0 %v1732_v28  ;;  %v424_v28 = vld [vmem:[#allocation3 + $0xa68] sm:$0xff] }
  0xff   :  { %1735 = vmatprep.subr.bf16.mxu0 %v1734_v29  ;;  %v428_v29 = vld [vmem:[#allocation3 + $0xa88] sm:$0xff]  ;;  %v1776_v31 = vpack.c.bf16 %v424_v28, %v421_v27  ;;  %v1944_v27 = vpack.c.bf16 %v1122_v60, %v1121_v23 }
 0x100   :  { %v1778_v33 = vpack.c.bf16 %v431_v30, %v428_v29  ;;  %v1123_v30 = vld [vmem:[#allocation7 + $0x20] sm:$0xff] }
 0x102   :  { %1737 = vmatpush1.bf16.msra.mxu0 %v1736_v35  ;;  %v430_v35 = vld [vmem:[#allocation3 + $0xa98] sm:$0xff] }
 0x103   :  { %1739 = vmatprep.subr.bf16.mxu0 %v1738_v36  ;;  %v434_v36 = vld [vmem:[#allocation3 + $0xab8] sm:$0xff]  ;;  %v1780_v38 = vpack.c.bf16 %v430_v35, %v427_v34  ;;  %v1142_v34 = vld [vmem:[#allocation7 + $0xb8] sm:$0xff] }
 0x104   :  { %v1782_v39 = vpack.c.bf16 %v437_v37, %v434_v36  ;;  %v1125_v37 = vld [vmem:[#allocation7 + $0x30] sm:$0xff] }
 0x106   :  { %1741 = vmatpush1.bf16.msra.mxu0 %v1740_v41  ;;  %v436_v41 = vld [vmem:[#allocation3 + $0xac8] sm:$0xff] }
 0x107   :  { %1743 = vmatprep.subr.bf16.mxu0 %v1742_v42  ;;  %v440_v42 = vld [vmem:[#allocation3 + $0xae8] sm:$0xff]  ;;  %v1784_v44 = vpack.c.bf16 %v436_v41, %v433_v40  ;;  %v1144_v40 = vld [vmem:[#allocation7 + $0xc8] sm:$0xff] }
 0x108   :  { %v1786_v45 = vpack.c.bf16 %v443_v43, %v440_v42  ;;  %v1127_v43 = vld [vmem:[#allocation7 + $0x40] sm:$0xff] }
 0x10a   :  { %1745 = vmatpush1.bf16.msra.mxu0 %v1744_v47  ;;  %v442_v47 = vld [vmem:[#allocation3 + $0xaf8] sm:$0xff] }
 0x10b   :  { %1747 = vmatprep.subr.bf16.mxu0 %v1746_v48  ;;  %v446_v48 = vld [vmem:[#allocation3 + $0xb18] sm:$0xff]  ;;  %v1788_v50 = vpack.c.bf16 %v442_v47, %v439_v46  ;;  %v1146_v46 = vld [vmem:[#allocation7 + $0xd8] sm:$0xff] }
 0x10c   :  { %v1790_v51 = vpack.c.bf16 %v449_v49, %v446_v48  ;;  %v1129_v49 = vld [vmem:[#allocation7 + $0x50] sm:$0xff] }
 0x10d   :  { %682 = vmatmul.mubr.f32.vlgmr.msra.gmra.mrb[0].mxu0 %v2230_v26  ;;  %v1760_v26 = vpack.c.bf16 %v400_v7, %v397_v6  ;;  %v467_v6 = vld [vmem:[#allocation3 + $0xbc0] sm:$0xff] }
 0x10e   :  { %1749 = vmatpush1.bf16.msra.mxu0 %v1748_v53  ;;  %752 = vmatprep.mubr.f32.mxu0 %v2235_v32  ;;  %v406_v32 = vld [vmem:[#allocation3 + $0x9d8] sm:$0xff]  ;;  %v448_v53 = vld [vmem:[#allocation3 + $0xb28] sm:$0xff] }
 0x10f   :  { %1751 = vmatprep.subr.bf16.mxu0 %v1750_v56  ;;  %v1764_v13 = vpack.c.bf16 %v406_v32, %v403_v11  ;;  %v452_v56 = vld [vmem:[#allocation3 + $0xb48] sm:$0xff]  ;;  %v1792_v58 = vpack.c.bf16 %v448_v53, %v445_v52  ;;  %v473_v11 = vld [vmem:[#allocation3 + $0xbf0] sm:$0xff] }
 0x110   :  { %v1794_v59 = vpack.c.bf16 %v455_v57, %v452_v56  ;;  %v469_v32 = vld [vmem:[#allocation3 + $0xbd0] sm:$0xff] }
 0x111   :  { %v1808_v28 = vpack.c.bf16 %v472_v12, %v469_v32  ;;  %v2113_v32 = vmov 0.0|0.0   ;;  %v1057_v12 = vlaneseq }
 0x112   :  { %1753 = vmatpush1.bf16.msra.mxu0 %v1752_v62  ;;  %v454_v62 = vld [vmem:[#allocation3 + $0xb58] sm:$0xff] }
 0x113   :  { %1755 = vmatprep.subr.bf16.mxu0 %v1754_v63  ;;  %v458_v63 = vld [vmem:[#allocation3 + $0xb78] sm:$0xff]  ;;  %v1796_v1 = vpack.c.bf16 %v454_v62, %v451_v61 }
 0x114   :  { %v1798_v2 = vpack.c.bf16 %v461_v0, %v458_v63 }
 0x116   :  { %1757 = vmatpush1.bf16.msra.mxu0 %v1756_v4  ;;  %v460_v4 = vld [vmem:[#allocation3 + $0xb88] sm:$0xff] }
 0x117   :  { %1759 = vmatprep.subr.bf16.mxu0 %v1758_v5  ;;  %v464_v5 = vld [vmem:[#allocation3 + $0xba8] sm:$0xff]  ;;  %v1800_v7 = vpack.c.bf16 %v460_v4, %v457_v3 }
 0x118   :  { %v1802_v8 = vpack.c.bf16 %v467_v6, %v464_v5  ;;  %v1131_v4 = vld [vmem:[#allocation7 + $0x60] sm:$0xff]  ;;  %v1132_v5 = vld [vmem:[#allocation7 + $0x68] sm:$0xff] }
 0x119   :  { %v1964_v6 = vpack.c.bf16 %v1132_v5, %v1131_v4  ;;  %v1163_v4 = vld [vmem:[#allocation7 + $0x160] sm:$0xff]  ;;  %v1164_v5 = vld [vmem:[#allocation7 + $0x168] sm:$0xff] }
 0x11a   :  { %1761 = vmatpush1.bf16.msra.mxu0 %v1760_v26  ;;  %v466_v26 = vld [vmem:[#allocation3 + $0xbb8] sm:$0xff] }
 0x11b   :  { %1763 = vmatprep.subr.bf16.mxu0 %v1762_v10  ;;  %v470_v10 = vld [vmem:[#allocation3 + $0xbd8] sm:$0xff]  ;;  %v1804_v15 = vpack.c.bf16 %v466_v26, %v463_v9 }
 0x11c   :  { %v1133_v26 = vld [vmem:[#allocation7 + $0x70] sm:$0xff] }
 0x11e   :  { %1765 = vmatpush1.bf16.msra.mxu0 %v1764_v13  ;;  %v1136_v13 = vld [vmem:[#allocation7 + $0x88] sm:$0xff] }
 0x11f   :  { %1767 = vmatprep.subr.bf16.mxu0 %v1766_v14  ;;  %v1119_v14 = vld [vmem:[#allocation7] sm:$0xff]  ;;  %v1938_v16 = vpack.c.bf16 %v1136_v13, %v1135_v54  ;;  %v1058_v54 = vshrl.u32 %v1057_v12, 7 }
 0x120   :  { %v1940_v21 = vpack.c.bf16 %v1120_v17, %v1119_v14  ;;  %v1048_v14 = vld [vmem:[#allocation5] ss:$4 sm:$0x7]  ;;  %v1326_v12 = vld [vmem:[#allocation8] ss:$0 sm:$0xff] }
 0x121   :  { %1939 = vmatprep.subr.bf16.mxu1 %v1938_v16  ;;  %v1067_v13 = vsub.s32 2, %v1058_v54 }
 0x122   :  { %1769 = vmatpush1.bf16.msra.mxu0 %v1768_v19  ;;  %v1138_v19 = vld [vmem:[#allocation7 + $0x98] sm:$0xff]  ;;  %1941 = vmatpush3.bf16.msra.mxu1 %v1940_v21 }
 0x123   :  { %1771 = vmatprep.subr.bf16.mxu0 %v1770_v20  ;;  %v1806_v20 = vpack.c.bf16 %v473_v11, %v470_v10  ;;  %v1942_v22 = vpack.c.bf16 %v1138_v19, %v1137_v18  ;;  %v1134_v10 = vld [vmem:[#allocation7 + $0x78] sm:$0xff]  ;;  %v1068_v18 = vrot.slane %v1048_v14, %v1067_v13 }
 0x124   :  { %v1968_v11 = vpack.c.bf16 %v1134_v10, %v1133_v26  ;;  %v1050_v19 = vld [vmem:[#allocation5 + $0x1] ss:$4 sm:$0x7]  ;;  %v1052_v21 = vld [vmem:[#allocation5 + $0x2] ss:$4 sm:$0x7] }
 0x125   :  { %1943 = vmatprep.subr.bf16.mxu1 %v1942_v22  ;;  %v1093_v23 = vrot.slane %v1050_v19, %v1067_v13 }
 0x126   :  { %1773 = vmatpush1.bf16.msra.mxu0 %v1772_v24  ;;  %v1139_v24 = vld [vmem:[#allocation7 + $0xa0] sm:$0xff]  ;;  %1945 = vmatpush3.bf16.msra.mxu1 %v1944_v27 }
 0x127   :  { %1775 = vmatprep.subr.bf16.mxu0 %v1774_v25  ;;  %v1140_v25 = vld [vmem:[#allocation7 + $0xa8] sm:$0xff] }
 0x128   :  { %v1946_v29 = vpack.c.bf16 %v1140_v25, %v1139_v24  ;;  %v1112_v24 = vrot.slane %v1052_v21, %v1067_v13 }
 0x12a   :  { %1777 = vmatpush1.bf16.msra.mxu0 %v1776_v31  ;;  %v1124_v31 = vld [vmem:[#allocation7 + $0x28] sm:$0xff]  ;;  %1947 = vmatprep.subr.bf16.mxu1 %v1946_v29  ;;  %v1063_v29 = vsub.s32 1, %v1058_v54 }
 0x12b   :  { %1779 = vmatprep.subr.bf16.mxu0 %v1778_v33  ;;  %v1141_v33 = vld [vmem:[#allocation7 + $0xb0] sm:$0xff]  ;;  %v1948_v35 = vpack.c.bf16 %v1124_v31, %v1123_v30 }
 0x12c   :  { %v1950_v36 = vpack.c.bf16 %v1142_v34, %v1141_v33  ;;  %v1064_v31 = vrot.slane %v1048_v14, %v1063_v29 }
 0x12d   :  { %1949 = vmatpush3.bf16.msra.mxu1 %v1948_v35 }
 0x12e   :  { %1781 = vmatpush1.bf16.msra.mxu0 %v1780_v38  ;;  %v1126_v38 = vld [vmem:[#allocation7 + $0x38] sm:$0xff]  ;;  %1951 = vmatprep.subr.bf16.mxu1 %v1950_v36 }
 0x12f   :  { %1783 = vmatprep.subr.bf16.mxu0 %v1782_v39  ;;  %v1143_v39 = vld [vmem:[#allocation7 + $0xc0] sm:$0xff]  ;;  %v1952_v41 = vpack.c.bf16 %v1126_v38, %v1125_v37  ;;  %v1089_v38 = vrot.slane %v1050_v19, %v1063_v29 }
 0x130   :  { %v1954_v42 = vpack.c.bf16 %v1144_v40, %v1143_v39 }
 0x131   :  { %1953 = vmatpush3.bf16.msra.mxu1 %v1952_v41  ;;  %v1108_v41 = vrot.slane %v1052_v21, %v1063_v29 }
 0x132   :  { %1785 = vmatpush1.bf16.msra.mxu0 %v1784_v44  ;;  %v1128_v44 = vld [vmem:[#allocation7 + $0x48] sm:$0xff]  ;;  %1955 = vmatprep.subr.bf16.mxu1 %v1954_v42 }
 0x133   :  { %1787 = vmatprep.subr.bf16.mxu0 %v1786_v45  ;;  %v1145_v45 = vld [vmem:[#allocation7 + $0xd0] sm:$0xff]  ;;  %v1956_v47 = vpack.c.bf16 %v1128_v44, %v1127_v43  ;;  %v1151_v44 = vld [vmem:[#allocation7 + $0x100] sm:$0xff] }
 0x134   :  { %v1958_v48 = vpack.c.bf16 %v1146_v46, %v1145_v45  ;;  %v1152_v45 = vld [vmem:[#allocation7 + $0x108] sm:$0xff] }
 0x135   :  { %1957 = vmatpush3.bf16.msra.mxu1 %v1956_v47 }
 0x136   :  { %1789 = vmatpush1.bf16.msra.mxu0 %v1788_v50  ;;  %v1130_v50 = vld [vmem:[#allocation7 + $0x58] sm:$0xff]  ;;  %1959 = vmatprep.subr.bf16.mxu1 %v1958_v48  ;;  %v1971_v48 = vpack.c.bf16 %v1152_v45, %v1151_v44 }
 0x137   :  { %1791 = vmatprep.subr.bf16.mxu0 %v1790_v51  ;;  %v1960_v51 = vpack.c.bf16 %v1130_v50, %v1129_v49  ;;  %v1153_v50 = vld [vmem:[#allocation7 + $0x110] sm:$0xff] }
 0x139   :  { %1961 = vmatpush3.bf16.msra.mxu1 %v1960_v51  ;;  %v1154_v51 = vld [vmem:[#allocation7 + $0x118] sm:$0xff] }
 0x13a   :  { %1793 = vmatpush1.bf16.msra.mxu0 %v1792_v58 }
 0x13b   :  { %1795 = vmatprep.subr.bf16.mxu0 %v1794_v59 }
 0x13e   :  { %1797 = vmatpush1.bf16.msra.mxu0 %v1796_v1  ;;  %v1147_v1 = vld [vmem:[#allocation7 + $0xe0] sm:$0xff] }
 0x13f   :  { %1799 = vmatprep.subr.bf16.mxu0 %v1798_v2  ;;  %v1148_v2 = vld [vmem:[#allocation7 + $0xe8] sm:$0xff] }
 0x140   :  { %v1962_v3 = vpack.c.bf16 %v1148_v2, %v1147_v1  ;;  %v1161_v1 = vld [vmem:[#allocation7 + $0x150] sm:$0xff]  ;;  %v1162_v2 = vld [vmem:[#allocation7 + $0x158] sm:$0xff] }
 0x142   :  { %1801 = vmatpush1.bf16.msra.mxu0 %v1800_v7  ;;  %1963 = vmatprep.subr.bf16.mxu1 %v1962_v3  ;;  %v1149_v7 = vld [vmem:[#allocation7 + $0xf0] sm:$0xff]  ;;  %v1986_v3 = vpack.c.bf16 %v1162_v2, %v1161_v1 }
 0x143   :  { %1803 = vmatprep.subr.bf16.mxu0 %v1802_v8  ;;  %1965 = vmatpush3.bf16.msra.mxu1 %v1964_v6  ;;  %v1150_v8 = vld [vmem:[#allocation7 + $0xf8] sm:$0xff]  ;;  %v1989_v6 = vpack.c.bf16 %v1164_v5, %v1163_v4 }
 0x144   :  { %v1966_v9 = vpack.c.bf16 %v1150_v8, %v1149_v7  ;;  %v1165_v7 = vld [vmem:[#allocation7 + $0x170] sm:$0xff]  ;;  %v1166_v8 = vld [vmem:[#allocation7 + $0x178] sm:$0xff] }
 0x146   :  { %1805 = vmatpush1.bf16.msra.mxu0 %v1804_v15  ;;  %1967 = vmatprep.subr.bf16.mxu1 %v1966_v9  ;;  %v1992_v9 = vpack.c.bf16 %v1166_v8, %v1165_v7 }
 0x147   :  { %1807 = vmatprep.subr.bf16.mxu0 %v1806_v20  ;;  %1969 = vmatpush3.bf16.msra.mxu1 %v1968_v11 }
 0x148   :  { %1970 = vmatprep.subr.bf16.mxu1 %v2113_v32 }
 0x14a   :  { %1809 = vmatpush1.bf16.msra.mxu0 %v1808_v28  ;;  %v1059_v28 = vsub.s32 0, %v1058_v54 }
 0x14c   :  { %v1359_v52 = vpop.f32.mrb[0].mxu1  ;;  %v1060_v30 = vrot.slane %v1048_v14, %v1059_v28  ;;  %v1085_v35 = vrot.slane %v1050_v19, %v1059_v28  ;;  %v1104_v43 = vrot.slane %v1052_v21, %v1059_v28 }
 0x14d   :  { %753 = vmatmul.mubr.f32.vlgmr.msra.gmra.mrb[0].mxu0 %v2244_v55  ;;  %v1360_v53 = vpop.f32.mrb[1].mxu1 }
 0x14e   :  { %v1361_v55 = vadd.f32 %v1360_v53, %v1359_v52  ;;  %v1974_v52 = vpack.c.bf16 %v1154_v51, %v1153_v50  ;;  %v2115_v53 = vmov 0.0  }
 0x16d   :  { %v1394_v56 = vpop.f32.mrb[2].mxu1 }
 0x16e   :  { %v1395_v57 = vpop.f32.mrb[3].mxu1 }
 0x16f   :  { %v1396_v58 = vadd.f32 %v1395_v57, %v1394_v56  ;;  %v1156_v56 = vld [vmem:[#allocation7 + $0x128] sm:$0xff] }
 0x171   :  { %v896_v59 = vadd.f32 %v1396_v58, %v1361_v55  ;;  %v1155_v55 = vld [vmem:[#allocation7 + $0x120] sm:$0xff]  ;;  %v1157_v58 = vld [vmem:[#allocation7 + $0x130] sm:$0xff] }
 0x172   :  { %v1977_v57 = vpack.c.bf16 %v1156_v56, %v1155_v55 }
 0x18d   :  { %v1429_v61 = vpop.f32.mrb[4].mxu1 }
 0x18e   :  { %v1430_v62 = vpop.f32.mrb[5].mxu1 }
 0x18f   :  { %v1431_v63 = vadd.f32 %v1430_v62, %v1429_v61  ;;  %v1159_v62 = vld [vmem:[#allocation7 + $0x140] sm:$0xff] }
 0x191   :  { %v966_v0 = vadd.f32 %v1431_v63, %v896_v59  ;;  %v1158_v59 = vld [vmem:[#allocation7 + $0x138] sm:$0xff]  ;;  %v1160_v63 = vld [vmem:[#allocation7 + $0x148] sm:$0xff] }
 0x192   :  { %v1980_v61 = vpack.c.bf16 %v1158_v59, %v1157_v58 }
 0x1b1   :  { %v1464_v15 = vpop.f32.mrb[6].mxu1 }
 0x1b2   :  { %v1465_v16 = vpop.f32.mrb[7].mxu1 }
 0x1b3   :  { %v1466_v17 = vadd.f32 %v1465_v16, %v1464_v15 }
 0x1b5   :  { %v1036_v20 = vadd.f32 %v1466_v17, %v966_v0  ;;  %v1983_v0 = vpack.c.bf16 %v1160_v63, %v1159_v62 }
 0x1b7   :  { %v1074_v22 = vadd.f32 %v1068_v18, %v1036_v20 }
 0x1b9   :  { %1077 = vst [vmem:[%s2278_s5 + $0x10] sm:$0xff] %v1074_v22  ;;  %v1080_v60 = vmax.f32 %v1074_v22, 0.0 }
 0x1bb   :  { %v1099_v25 = vmul.f32 %v1093_v23, %v1080_v60 }
 0x1bd   :  { %v2254_v27 = vadd.f32 %v1112_v24, %v1099_v25 }
 0x220   :  { %v754_v33 = vpop.f32.mrb[0].mxu0 }
 0x221   :  { %v1072_v34 = vadd.f32 %v1060_v30, %v754_v33  ;;  %v756_v36 = vpop.f32.mrb[1].mxu0 }
 0x222   :  { %v1073_v37 = vadd.f32 %v1064_v31, %v756_v36 }
 0x223   :  { %1075 = vst [vmem:[%s2278_s5] sm:$0xff] %v1072_v34  ;;  %v1078_v39 = vmax.f32 %v1072_v34, 0.0 }
 0x224   :  { %1076 = vst [vmem:[%s2278_s5 + $0x8] sm:$0xff] %v1073_v37  ;;  %v1079_v40 = vmax.f32 %v1073_v37, 0.0 }
 0x225   :  { %v1097_v42 = vmul.f32 %v1085_v35, %v1078_v39 }
 0x226   :  { %v1098_v46 = vmul.f32 %v1089_v38, %v1079_v40 }
 0x227   :  { %v1116_v49 = vadd.f32 %v1104_v43, %v1097_v42 }
 0x228   :  { %v1117_v47 = vadd.f32 %v1108_v41, %v1098_v46 }
 0x22a   :  { %1238 = vmatprep.mubr.f32.mxu1 %v1117_v47 }
 0x22b   :  { %1239 = vmatmul.mubr.f32.vlgmr.msra.gmra.mrb[8].mxu1 %v1116_v49 }
 0x22c   :  { %1972 = vmatpush3.bf16.msra.mxu1 %v1971_v48  ;;  %1551 = vmatprep.mubr.msk.f32.mxu1 %vm2114_vm0, %v2115_v53 }
 0x22d   :  { %1973 = vmatprep.subr.bf16.mxu1 %v2113_v32 }
 0x230   :  { %1975 = vmatpush3.bf16.msra.mxu1 %v1974_v52 }
 0x231   :  { %1976 = vmatprep.subr.bf16.mxu1 %v2113_v32 }
 0x234   :  { %1978 = vmatpush3.bf16.msra.mxu1 %v1977_v57 }
 0x235   :  { %1979 = vmatprep.subr.bf16.mxu1 %v2113_v32 }
 0x238   :  { %1981 = vmatpush3.bf16.msra.mxu1 %v1980_v61 }
 0x239   :  { %1982 = vmatprep.subr.bf16.mxu1 %v2113_v32 }
 0x23c   :  { %1984 = vmatpush3.bf16.msra.mxu1 %v1983_v0 }
 0x23d   :  { %1985 = vmatprep.subr.bf16.mxu1 %v2113_v32 }
 0x240   :  { %1987 = vmatpush3.bf16.msra.mxu1 %v1986_v3 }
 0x241   :  { %1988 = vmatprep.subr.bf16.mxu1 %v2113_v32 }
 0x244   :  { %1990 = vmatpush3.bf16.msra.mxu1 %v1989_v6 }
 0x245   :  { %1991 = vmatprep.subr.bf16.mxu1 %v2113_v32 }
 0x248   :  { %1993 = vmatpush3.bf16.msra.mxu1 %v1992_v9 }
 0x24b   :  { %1552 = vmatmul.mubr.f32.vlgmr.msra.gmra.mrb[10].mxu1 %v2254_v27 }
 0x2fe   :  { %v1499_v26 = vpop.f32.mrb[8].mxu1 }
 0x2ff   :  { %v1500_v10 = vpop.f32.mrb[9].mxu1 }
 0x300   :  { %v1501_v11 = vadd.f32 %v1500_v10, %v1499_v26 }
 0x302   :  { %v1241_v54 = vadd.f32 %v1501_v11, %v1326_v12 }
 0x31e   :  { %v1310_v13 = vpop.f32.mrb[10].mxu1 }
 0x31f   :  { %v1311_v14 = vadd.f32 %v1310_v13, %v1241_v54  ;;  %v1553_v15 = vpop.f32.mrb[11].mxu1 }
 0x321   :  { %1314 = vst [vmem:[%s2279_s6] sm:$0xff] %v1311_v14 }
 0x322   :  { %1323 = vsyncpa [#allocation4], 1 }
 0x323   :  { %1324 = vsyncpa [#allocation6], 1 }
 0x324   :  { %1325 = vsyncpa [#allocation9], 1 }

</bundles_post_ra>
